<compile_context>
chip_gen: v7x
topology: tpu7x:2x2x1
jax: 0.10.0
libtpu: 0.0.40
codegen_flags: <defaults>
</compile_context>

<pallas_src>
import functools
import numpy as np

import jax
import jax.numpy as jnp
from jax.experimental import pallas as pl
from jax.experimental.pallas import tpu as pltpu

# ----------------------------- config ---------------------------------------
PARAMS = dict(
    vocab_size=100,
    seg_vocab_size=2,
    age_vocab_size=50,
    max_seq_length=16,
    hidden_size=32,
    num_attention_heads=2,
    intermediate_size=64,
    aggregator_num_layer=2,
    hidden_dropout_prob=0.1,   # identity in eval
)
LN_EPS = 1e-12
_GELU_C = 0.7978845608028654   # sqrt(2/pi)


def _cdiv(a, b):
    return -(-a // b)


def _round_up(a, b):
    return _cdiv(a, b) * b


# --------------------------- math helpers (pure jnp) --------------------------
def _layer_norm(x, gamma, beta):
    # BertLayerNorm: biased variance, eps inside the rsqrt.
    u = jnp.mean(x, axis=-1, keepdims=True)
    s = jnp.mean((x - u) ** 2, axis=-1, keepdims=True)
    return (x - u) * jax.lax.rsqrt(s + LN_EPS) * gamma + beta


def _gelu(x):
    # TODO(synk): Bert.modeling uses the erf-based GELU; the tanh approximation
    # differs at ~1e-3 but avoids depending on an erf lowering in Mosaic.
    return 0.5 * x * (1.0 + jnp.tanh(_GELU_C * (x + 0.044715 * x * x * x)))


# ------------------------------ fused kernel ---------------------------------
def cehrbehrt_kernel(ids_ref, mask_ref, ftab_ref, stab_ref, evec_ref,
                     wqkv_ref, wo_ref, wi_ref, wo2_ref, lvec_ref, out_ref,
                     *, n_layers, n_heads, d_head, seq, tb, hidden, inter,
                     n_word, n_age):
    """One grid step = TB batch elements: gather + embed-LN + N BERT layers."""
    H, I, S, TB = hidden, inter, seq, tb
    M = TB * S
    f32, bf16 = jnp.float32, jnp.bfloat16

    ids = ids_ref[...]                                    # (TB, S, 4) int32
    wid = ids[:, :, 0:1]                                  # (TB, S, 1)
    aid = ids[:, :, 1:2]
    pid = ids[:, :, 2:3]
    sid = ids[:, :, 3:4]

    # ---- fused one-hot gather + (3H->H) transform (tables pre-folded) -------
    VT = ftab_ref.shape[0]
    iota_v = jax.lax.broadcasted_iota(jnp.int32, (TB, S, VT), 2)
    onehot = ((iota_v == wid)
              | (iota_v == aid + n_word)
              | (iota_v == pid + (n_word + n_age)))
    onehot = jnp.where(onehot, 1.0, 0.0).astype(bf16).reshape(M, VT)
    emb = jnp.dot(onehot, ftab_ref[...], preferred_element_type=f32)   # (M, H)

    VS = stab_ref.shape[0]
    iota_s = jax.lax.broadcasted_iota(jnp.int32, (TB, S, VS), 2)
    seg_oh = jnp.where(iota_s == sid, 1.0, 0.0).astype(bf16).reshape(M, VS)
    seg_e = jnp.dot(seg_oh, stab_ref[...], preferred_element_type=f32)  # (M, H)

    ev = evec_ref[...]                                    # (8, LW) f32
    h = _layer_norm(jnp.tanh(emb + ev[0:1, :H]) + seg_e,
                    ev[1:2, :H], ev[2:3, :H])             # (M, H) f32

    # additive attention mask, (TB, 1, S): broadcasts over heads & query pos
    addm = (1.0 - mask_ref[...].astype(f32)) * -10000.0

    scale = 1.0 / float(np.sqrt(d_head))

    # ---- aggregator: post-LN BERT layers; hidden state never leaves VMEM ----
    for layer in range(n_layers):                         # static unroll (L=2)
        x = h
        lv = lvec_ref[layer]                              # (8, LW) f32

        qkv = (jnp.dot(x.astype(bf16), wqkv_ref[layer],
                       preferred_element_type=f32)
               + lv[0:1, :3 * H])                         # (M, 3H)

        ctxs = []
        for hh in range(n_heads):                         # static unroll
            lo = hh * d_head
            qh = qkv[:, lo:lo + d_head].reshape(TB, S, d_head)
            kh = qkv[:, H + lo:H + lo + d_head].reshape(TB, S, d_head)
            vh = qkv[:, 2 * H + lo:2 * H + lo + d_head].reshape(TB, S, d_head)

            sc = jnp.einsum('bqd,bkd->bqk', qh.astype(bf16), kh.astype(bf16),
                            preferred_element_type=f32) * scale + addm
            sc = sc - jnp.max(sc, axis=-1, keepdims=True)
            e = jnp.exp(sc)
            p = e / jnp.sum(e, axis=-1, keepdims=True)    # exact softmax (f32)
            ctx = jnp.einsum('bqk,bkd->bqd', p.astype(bf16), vh.astype(bf16),
                             preferred_element_type=f32)  # (TB, S, d_head)
            ctxs.append(ctx.reshape(M, d_head))

        ctx_all = jnp.concatenate(ctxs, axis=-1)          # (M, H)
        attn = (jnp.dot(ctx_all.astype(bf16), wo_ref[layer],
                        preferred_element_type=f32) + lv[1:2, :H])
        h1 = _layer_norm(attn + x, lv[2:3, :H], lv[3:4, :H])

        ffn = (jnp.dot(h1.astype(bf16), wi_ref[layer],
                       preferred_element_type=f32) + lv[4:5, :I])
        ffn = _gelu(ffn)
        ffo = (jnp.dot(ffn.astype(bf16), wo2_ref[layer],
                       preferred_element_type=f32) + lv[5:6, :H])
        h = _layer_norm(ffo + h1, lv[6:7, :H], lv[7:8, :H])

    # ---- lane-dense store: (TB, S*H) rows instead of 32-lane masked rows ----
    h3 = h.reshape(TB, S, H)
    dense = jnp.concatenate([h3[:, si, :] for si in range(S)], axis=-1)  # (TB, S*H)
    out_ref[...] = dense[:, None, :]


# ------------------------------- wrapper --------------------------------------
def cehrbehrt_forward(params, cfg, record, age, seg, position, att_mask):
    H = cfg["hidden_size"]
    I = cfg["intermediate_size"]
    L = cfg["aggregator_num_layer"]
    nh = cfg["num_attention_heads"]
    dh = H // nh
    B, S = record.shape
    VW = params["word_emb"].shape[0]
    VA = params["age_emb"].shape[0]
    VP = params["posi_emb"].shape[0]
    VSg = params["seg_emb"].shape[0]

    # batch blocking: aim for >=256 matmul rows (TB*S) per grid step.
    # (On v7x with larger B, a grid length that's a multiple of 2 would use
    #  both TensorCores; at B=2 the whole batch fits in one step.)
    TB = max(1, min(B, _cdiv(256, S)))
    Bp = _round_up(B, TB)
    nb = Bp // TB

    # integer inputs: ids packed (B,S,4) [word, age, posi, seg]; mask (B,1,S)
    ids = jnp.stack([record, age, position, seg], axis=-1).astype(jnp.int32)
    mask = att_mask.astype(jnp.int32)[:, None, :]
    if Bp != B:
        ids = jnp.pad(ids, ((0, Bp - B), (0, 0), (0, 0)))
        mask = jnp.pad(mask, ((0, Bp - B), (0, 0), (0, 0)))

    # fold word/age/posi tables into the 3H->H transform (exact):
    #   cat([w,a,p]) @ W3 == onehot_combined @ concat(T_w@W3a, T_a@W3b, T_p@W3c)
    w3 = params["transform_w"]                                   # (3H, H)
    ftab = jnp.concatenate([params["word_emb"] @ w3[0:H],
                            params["age_emb"] @ w3[H:2 * H],
                            params["posi_emb"] @ w3[2 * H:3 * H]], axis=0)
    VT = VW + VA + VP
    VT_pad = _round_up(max(VT, 128), 128)
    ftab = jnp.pad(ftab, ((0, VT_pad - VT), (0, 0))).astype(jnp.bfloat16)

    VS_pad = _round_up(max(VSg, 16), 16)
    stab = jnp.pad(params["seg_emb"],
                   ((0, VS_pad - VSg), (0, 0))).astype(jnp.bfloat16)

    # pack all small bias / LayerNorm vectors into (8, LW) slabs
    LW = _round_up(max(3 * H, I, 128), 128)
    pad_row = lambda v: jnp.pad(
        v, ((0, 0),) * (v.ndim - 1) + ((0, LW - v.shape[-1]),))
    evec = jnp.stack([pad_row(params["transform_b"]),
                      pad_row(params["emb_ln_g"]),
                      pad_row(params["emb_ln_b"])]
                     + [jnp.zeros((LW,), jnp.float32)] * 5, axis=0)  # (8, LW)
    lvec = jnp.stack([pad_row(params["bqkv"]), pad_row(params["bo"]),
                      pad_row(params["ln1_g"]), pad_row(params["ln1_b"]),
                      pad_row(params["bi"]), pad_row(params["bo2"]),
                      pad_row(params["ln2_g"]), pad_row(params["ln2_b"])],
                     axis=1)                                         # (L, 8, LW)

    bf = jnp.bfloat16
    wqkv = params["wqkv"].astype(bf)       # (L, H, 3H)
    wo = params["wo"].astype(bf)           # (L, H, H)
    wi = params["wi"].astype(bf)           # (L, H, I)
    wo2 = params["wo2"].astype(bf)         # (L, I, H)

    kern = functools.partial(
        cehrbehrt_kernel, n_layers=L, n_heads=nh, d_head=dh, seq=S, tb=TB,
        hidden=H, inter=I, n_word=VW, n_age=VA)

    batch_map3 = lambda b: (b, 0, 0)
    const2 = lambda b: (0, 0)
    const3 = lambda b: (0, 0, 0)

    out = pl.pallas_call(
        kern,
        out_shape=jax.ShapeDtypeStruct((Bp, 1, S * H), jnp.float32),
        grid=(nb,),
        in_specs=[
            pl.BlockSpec((TB, S, 4), batch_map3),       # packed ids
            pl.BlockSpec((TB, 1, S), batch_map3),       # attention mask
            pl.BlockSpec((VT_pad, H), const2),          # folded word|age|posi table
            pl.BlockSpec((VS_pad, H), const2),          # segment table
            pl.BlockSpec((8, LW), const2),              # embedding-stage vectors
            pl.BlockSpec((L, H, 3 * H), const3),        # fused QKV weights
            pl.BlockSpec((L, H, H), const3),            # attention output weights
            pl.BlockSpec((L, H, I), const3),            # FFN in weights
            pl.BlockSpec((L, I, H), const3),            # FFN out weights
            pl.BlockSpec((L, 8, LW), const3),           # per-layer bias/LN vectors
        ],
        out_specs=pl.BlockSpec((TB, 1, S * H), batch_map3),
        compiler_params=pltpu.CompilerParams(
            dimension_semantics=("parallel",)),
    )(ids, mask, ftab, stab, evec, wqkv, wo, wi, wo2, lvec)

    return out[:B].reshape(B, S, H)


# -------------------------- pure-JAX reference --------------------------------
def cehrbehrt_reference(params, cfg, record, age, seg, position, att_mask):
    H = cfg["hidden_size"]
    nh = cfg["num_attention_heads"]
    dh = H // nh
    w = params["word_emb"][record]
    a = params["age_emb"][age]
    p = params["posi_emb"][position]
    s = params["seg_emb"][seg]
    x = jnp.concatenate([w, a, p], -1) @ params["transform_w"] + params["transform_b"]
    h = _layer_norm(jnp.tanh(x) + s, params["emb_ln_g"], params["emb_ln_b"])
    addm = ((1.0 - att_mask.astype(jnp.float32)) * -10000.0)[:, None, None, :]
    B, S, _ = h.shape
    for l in range(cfg["aggregator_num_layer"]):
        qkv = h @ params["wqkv"][l] + params["bqkv"][l]
        q, k, v = jnp.split(qkv, 3, axis=-1)
        q = q.reshape(B, S, nh, dh).transpose(0, 2, 1, 3)
        k = k.reshape(B, S, nh, dh).transpose(0, 2, 1, 3)
        v = v.reshape(B, S, nh, dh).transpose(0, 2, 1, 3)
        sc = jnp.einsum('bhqd,bhkd->bhqk', q, k) / np.sqrt(dh) + addm
        pr = jax.nn.softmax(sc, axis=-1)
        ctx = jnp.einsum('bhqk,bhkd->bhqd', pr, v).transpose(0, 2, 1, 3).reshape(B, S, H)
        attn = ctx @ params["wo"][l] + params["bo"][l]
        h1 = _layer_norm(attn + h, params["ln1_g"][l], params["ln1_b"][l])
        ffn = _gelu(h1 @ params["wi"][l] + params["bi"][l])
        ffo = ffn @ params["wo2"][l] + params["bo2"][l]
        h = _layer_norm(ffo + h1, params["ln2_g"][l], params["ln2_b"][l])
    return h


# --------------------------- parameter init ----------------------------------
def sinusoid_posi_table(max_len, hidden):
    table = np.zeros((max_len, hidden), dtype=np.float32)
    for pos in range(max_len):
        for idx in range(0, hidden, 2):
            table[pos, idx] = np.sin(pos / 10000 ** (2 * idx / hidden))
        for idx in range(1, hidden, 2):
            table[pos, idx] = np.cos(pos / 10000 ** (2 * idx / hidden))
    return jnp.asarray(table)


def init_params(key, p):
    H, I, L = p["hidden_size"], p["intermediate_size"], p["aggregator_num_layer"]
    keys = iter(jax.random.split(key, 16))
    nrm = lambda shape: 0.02 * jax.random.normal(next(keys), shape, jnp.float32)
    zeros = lambda shape: jnp.zeros(shape, jnp.float32)
    ones = lambda shape: jnp.ones(shape, jnp.float32)
    return {
        "word_emb": nrm((p["vocab_size"], H)),
        "seg_emb": nrm((p["seg_vocab_size"], H)),
        "age_emb": nrm((p["age_vocab_size"], H)),
        "posi_emb": sinusoid_posi_table(p["max_seq_length"], H),
        # Linear weights stored (in_features, out_features) = torch weight.T
        "transform_w": nrm((3 * H, H)),
        "transform_b": zeros((H,)),
        "emb_ln_g": ones((H,)),
        "emb_ln_b": zeros((H,)),
        # per-layer stacks (leading layer axis); QKV fused along out features
        "wqkv": nrm((L, H, 3 * H)),
        "bqkv": zeros((L, 3 * H)),
        "wo": nrm((L, H, H)),
        "bo": zeros((L, H)),
        "ln1_g": ones((L, H)),
        "ln1_b": zeros((L, H)),
        "wi": nrm((L, H, I)),
        "bi": zeros((L, I)),
        "wo2": nrm((L, I, H)),
        "bo2": zeros((L, H)),
        "ln2_g": ones((L, H)),
        "ln2_b": zeros((L, H)),
    }


# --------------------------------- main ---------------------------------------
if __name__ == "__main__":
    cfg = PARAMS
    B, S = 2, 8

    key = jax.random.PRNGKey(0)
    k_param, k_rec, k_age, k_seg = jax.random.split(key, 4)
    params = init_params(k_param, cfg)

    record = jax.random.randint(k_rec, (B, S), 0, cfg["vocab_size"], jnp.int32)
    age = jax.random.randint(k_age, (B, S), 0, cfg["age_vocab_size"], jnp.int32)
    seg = jax.random.randint(k_seg, (B, S), 0, cfg["seg_vocab_size"], jnp.int32)
    position = jnp.tile(jnp.arange(S, dtype=jnp.int32)[None, :], (B, 1))
    att_mask = jnp.ones((B, S), jnp.int32).at[1, S - 2:].set(0)  # pad tail of batch 1

    out = cehrbehrt_forward(params, cfg, record, age, seg, position, att_mask)
    out = jax.block_until_ready(out)
    assert out.shape == (B, S, cfg["hidden_size"])
    assert bool(jnp.all(jnp.isfinite(out)))

    # parity with a pure-JAX f32 reference (kernel uses bf16 matmul operands)
    ref = cehrbehrt_reference(params, cfg, record, age, seg, position, att_mask)
    err = float(jnp.max(jnp.abs(out - ref)))
    assert err < 1e-1, f"max abs error vs reference too large: {err}"
    print("KERNEL_OK")
</pallas_src>

<mosaic_0001>
module attributes {stable_mosaic.version = 11 : i64} {
  func.func @cehrbehrt_kernel(%arg0: i32, %arg1: memref<2x8x4xi32, #tpu.memory_space<vmem>>, %arg2: memref<2x1x8xi32, #tpu.memory_space<vmem>>, %arg3: memref<256x32xbf16, #tpu.memory_space<vmem>>, %arg4: memref<16x32xbf16, #tpu.memory_space<vmem>>, %arg5: memref<8x128xf32, #tpu.memory_space<vmem>>, %arg6: memref<2x32x96xbf16, #tpu.memory_space<vmem>>, %arg7: memref<2x32x32xbf16, #tpu.memory_space<vmem>>, %arg8: memref<2x32x64xbf16, #tpu.memory_space<vmem>>, %arg9: memref<2x64x32xbf16, #tpu.memory_space<vmem>>, %arg10: memref<2x8x128xf32, #tpu.memory_space<vmem>>, %arg11: memref<2x1x256xf32, #tpu.memory_space<vmem>>) attributes {dimension_semantics = [#tpu.dimension_semantics<parallel>], iteration_bounds = array<i64: 1>, scalar_prefetch = 0 : i64, scratch_operands = 0 : i64, tpu.core_type = #tpu.core_type<tc>, window_params = [{transform_indices = @transform_0, window_bounds = array<i64: 2, 8, 4>}, {transform_indices = @transform_1, window_bounds = array<i64: 2, 1, 8>}, {pipeline_mode = #tpu.pipeline_mode<synchronous>, transform_indices = @transform_2, window_bounds = array<i64: 256, 32>}, {pipeline_mode = #tpu.pipeline_mode<synchronous>, transform_indices = @transform_3, window_bounds = array<i64: 16, 32>}, {pipeline_mode = #tpu.pipeline_mode<synchronous>, transform_indices = @transform_4, window_bounds = array<i64: 8, 128>}, {pipeline_mode = #tpu.pipeline_mode<synchronous>, transform_indices = @transform_5, window_bounds = array<i64: 2, 32, 96>}, {pipeline_mode = #tpu.pipeline_mode<synchronous>, transform_indices = @transform_6, window_bounds = array<i64: 2, 32, 32>}, {pipeline_mode = #tpu.pipeline_mode<synchronous>, transform_indices = @transform_7, window_bounds = array<i64: 2, 32, 64>}, {pipeline_mode = #tpu.pipeline_mode<synchronous>, transform_indices = @transform_8, window_bounds = array<i64: 2, 64, 32>}, {pipeline_mode = #tpu.pipeline_mode<synchronous>, transform_indices = @transform_9, window_bounds = array<i64: 2, 8, 128>}, {transform_indices = @transform_10, window_bounds = array<i64: 2, 1, 256>}]} {
    %c0 = arith.constant 0 : index
    %c0_0 = arith.constant 0 : index
    %c0_1 = arith.constant 0 : index
    %0 = vector.load %arg1[%c0, %c0_0, %c0_1] : memref<2x8x4xi32, #tpu.memory_space<vmem>>, vector<2x8x4xi32>
    %1 = vector.extract_strided_slice %0 {offsets = [0, 0, 0], sizes = [2, 8, 1], strides = [1, 1, 1]} : vector<2x8x4xi32> to vector<2x8x1xi32>
    %2 = vector.extract_strided_slice %0 {offsets = [0, 0, 1], sizes = [2, 8, 1], strides = [1, 1, 1]} : vector<2x8x4xi32> to vector<2x8x1xi32>
    %3 = vector.extract_strided_slice %0 {offsets = [0, 0, 2], sizes = [2, 8, 1], strides = [1, 1, 1]} : vector<2x8x4xi32> to vector<2x8x1xi32>
    %4 = vector.extract_strided_slice %0 {offsets = [0, 0, 3], sizes = [2, 8, 1], strides = [1, 1, 1]} : vector<2x8x4xi32> to vector<2x8x1xi32>
    %5 = tpu.iota {dimensions = array<i32: 2>} : vector<2x8x256xi32>
    %6 = vector.broadcast %1 : vector<2x8x1xi32> to vector<2x8x256xi32>
    %7 = arith.cmpi eq, %5, %6 : vector<2x8x256xi32>
    %c100_i32 = arith.constant 100 : i32
    %8 = vector.broadcast %c100_i32 : i32 to vector<2x8x1xi32>
    %9 = arith.addi %2, %8 : vector<2x8x1xi32>
    %10 = vector.broadcast %9 : vector<2x8x1xi32> to vector<2x8x256xi32>
    %11 = arith.cmpi eq, %5, %10 : vector<2x8x256xi32>
    %12 = arith.ori %7, %11 : vector<2x8x256xi1>
    %c150_i32 = arith.constant 150 : i32
    %13 = vector.broadcast %c150_i32 : i32 to vector<2x8x1xi32>
    %14 = arith.addi %3, %13 : vector<2x8x1xi32>
    %15 = vector.broadcast %14 : vector<2x8x1xi32> to vector<2x8x256xi32>
    %16 = arith.cmpi eq, %5, %15 : vector<2x8x256xi32>
    %17 = arith.ori %12, %16 : vector<2x8x256xi1>
    %cst = arith.constant 1.000000e+00 : f32
    %cst_2 = arith.constant 0.000000e+00 : f32
    %18 = vector.broadcast %cst : f32 to vector<2x8x256xf32>
    %19 = vector.broadcast %cst_2 : f32 to vector<2x8x256xf32>
    %20 = arith.select %17, %18, %19 : vector<2x8x256xi1>, vector<2x8x256xf32>
    %21 = arith.truncf %20 : vector<2x8x256xf32> to vector<2x8x256xbf16>
    %22 = vector.shape_cast %21 : vector<2x8x256xbf16> to vector<16x256xbf16>
    %c0_3 = arith.constant 0 : index
    %c0_4 = arith.constant 0 : index
    %23 = vector.load %arg3[%c0_3, %c0_4] : memref<256x32xbf16, #tpu.memory_space<vmem>>, vector<256x32xbf16>
    %cst_5 = arith.constant dense<0.000000e+00> : vector<16x32xf32>
    %24 = tpu.matmul %22, %23, %cst_5 {dimension_numbers = #tpu.dot_dimension_numbers<[1], [0], [0], [1], [0, 0, 1, 1], [], []>} : vector<16x256xbf16>, vector<256x32xbf16>, vector<16x32xf32> -> vector<16x32xf32>
    %25 = tpu.iota {dimensions = array<i32: 2>} : vector<2x8x16xi32>
    %26 = vector.broadcast %4 : vector<2x8x1xi32> to vector<2x8x16xi32>
    %27 = arith.cmpi eq, %25, %26 : vector<2x8x16xi32>
    %cst_6 = arith.constant 1.000000e+00 : f32
    %cst_7 = arith.constant 0.000000e+00 : f32
    %28 = vector.broadcast %cst_6 : f32 to vector<2x8x16xf32>
    %29 = vector.broadcast %cst_7 : f32 to vector<2x8x16xf32>
    %30 = arith.select %27, %28, %29 : vector<2x8x16xi1>, vector<2x8x16xf32>
    %31 = arith.truncf %30 : vector<2x8x16xf32> to vector<2x8x16xbf16>
    %32 = vector.shape_cast %31 : vector<2x8x16xbf16> to vector<16x16xbf16>
    %c0_8 = arith.constant 0 : index
    %c0_9 = arith.constant 0 : index
    %33 = vector.load %arg4[%c0_8, %c0_9] : memref<16x32xbf16, #tpu.memory_space<vmem>>, vector<16x32xbf16>
    %cst_10 = arith.constant dense<0.000000e+00> : vector<16x32xf32>
    %34 = tpu.matmul %32, %33, %cst_10 {dimension_numbers = #tpu.dot_dimension_numbers<[1], [0], [0], [1], [0, 0, 1, 1], [], []>} : vector<16x16xbf16>, vector<16x32xbf16>, vector<16x32xf32> -> vector<16x32xf32>
    %c0_11 = arith.constant 0 : index
    %c0_12 = arith.constant 0 : index
    %35 = vector.load %arg5[%c0_11, %c0_12] : memref<8x128xf32, #tpu.memory_space<vmem>>, vector<8x128xf32>
    %36 = vector.extract_strided_slice %35 {offsets = [0, 0], sizes = [1, 32], strides = [1, 1]} : vector<8x128xf32> to vector<1x32xf32>
    %37 = vector.broadcast %36 : vector<1x32xf32> to vector<16x32xf32>
    %38 = arith.addf %24, %37 : vector<16x32xf32>
    %39 = math.tanh %38 : vector<16x32xf32>
    %40 = arith.addf %39, %34 : vector<16x32xf32>
    %41 = vector.extract_strided_slice %35 {offsets = [1, 0], sizes = [1, 32], strides = [1, 1]} : vector<8x128xf32> to vector<1x32xf32>
    %42 = vector.extract_strided_slice %35 {offsets = [2, 0], sizes = [1, 32], strides = [1, 1]} : vector<8x128xf32> to vector<1x32xf32>
    %cst_13 = arith.constant dense<0.000000e+00> : vector<16xf32>
    %43 = vector.multi_reduction <add>, %40, %cst_13 [1] : vector<16x32xf32> to vector<16xf32>
    %44 = vector.shape_cast %43 : vector<16xf32> to vector<16x1xf32>
    %cst_14 = arith.constant 3.200000e+01 : f32
    %45 = vector.broadcast %cst_14 : f32 to vector<16x1xf32>
    %46 = arith.divf %44, %45 : vector<16x1xf32>
    %47 = vector.broadcast %46 : vector<16x1xf32> to vector<16x32xf32>
    %48 = arith.subf %40, %47 : vector<16x32xf32>
    %49 = arith.mulf %48, %48 : vector<16x32xf32>
    %cst_15 = arith.constant dense<0.000000e+00> : vector<16xf32>
    %50 = vector.multi_reduction <add>, %49, %cst_15 [1] : vector<16x32xf32> to vector<16xf32>
    %51 = vector.shape_cast %50 : vector<16xf32> to vector<16x1xf32>
    %cst_16 = arith.constant 3.200000e+01 : f32
    %52 = vector.broadcast %cst_16 : f32 to vector<16x1xf32>
    %53 = arith.divf %51, %52 : vector<16x1xf32>
    %54 = vector.broadcast %46 : vector<16x1xf32> to vector<16x32xf32>
    %55 = arith.subf %40, %54 : vector<16x32xf32>
    %cst_17 = arith.constant 9.99999996E-13 : f32
    %56 = vector.broadcast %cst_17 : f32 to vector<16x1xf32>
    %57 = arith.addf %53, %56 : vector<16x1xf32>
    %58 = math.rsqrt %57 : vector<16x1xf32>
    %59 = vector.broadcast %58 : vector<16x1xf32> to vector<16x32xf32>
    %60 = arith.mulf %55, %59 : vector<16x32xf32>
    %61 = vector.broadcast %41 : vector<1x32xf32> to vector<16x32xf32>
    %62 = arith.mulf %60, %61 : vector<16x32xf32>
    %63 = vector.broadcast %42 : vector<1x32xf32> to vector<16x32xf32>
    %64 = arith.addf %62, %63 : vector<16x32xf32>
    %c0_18 = arith.constant 0 : index
    %c0_19 = arith.constant 0 : index
    %c0_20 = arith.constant 0 : index
    %65 = vector.load %arg2[%c0_18, %c0_19, %c0_20] : memref<2x1x8xi32, #tpu.memory_space<vmem>>, vector<2x1x8xi32>
    %66 = arith.sitofp %65 : vector<2x1x8xi32> to vector<2x1x8xf32>
    %cst_21 = arith.constant 1.000000e+00 : f32
    %67 = vector.broadcast %cst_21 : f32 to vector<2x1x8xf32>
    %68 = arith.subf %67, %66 : vector<2x1x8xf32>
    %cst_22 = arith.constant -1.000000e+04 : f32
    %69 = vector.broadcast %cst_22 : f32 to vector<2x1x8xf32>
    %70 = arith.mulf %68, %69 : vector<2x1x8xf32>
    %c0_23 = arith.constant 0 : index
    %c0_24 = arith.constant 0 : index
    %c0_25 = arith.constant 0 : index
    %71 = vector.load %arg10[%c0_23, %c0_24, %c0_25] : memref<2x8x128xf32, #tpu.memory_space<vmem>>, vector<1x8x128xf32>
    %72 = vector.shape_cast %71 : vector<1x8x128xf32> to vector<8x128xf32>
    %73 = arith.truncf %64 : vector<16x32xf32> to vector<16x32xbf16>
    %c0_26 = arith.constant 0 : index
    %c0_27 = arith.constant 0 : index
    %c0_28 = arith.constant 0 : index
    %74 = vector.load %arg6[%c0_26, %c0_27, %c0_28] : memref<2x32x96xbf16, #tpu.memory_space<vmem>>, vector<1x32x96xbf16>
    %75 = vector.shape_cast %74 : vector<1x32x96xbf16> to vector<32x96xbf16>
    %cst_29 = arith.constant dense<0.000000e+00> : vector<16x96xf32>
    %76 = tpu.matmul %73, %75, %cst_29 {dimension_numbers = #tpu.dot_dimension_numbers<[1], [0], [0], [1], [0, 0, 1, 1], [], []>} : vector<16x32xbf16>, vector<32x96xbf16>, vector<16x96xf32> -> vector<16x96xf32>
    %77 = vector.extract_strided_slice %72 {offsets = [0, 0], sizes = [1, 96], strides = [1, 1]} : vector<8x128xf32> to vector<1x96xf32>
    %78 = vector.broadcast %77 : vector<1x96xf32> to vector<16x96xf32>
    %79 = arith.addf %76, %78 : vector<16x96xf32>
    %80 = vector.extract_strided_slice %79 {offsets = [0, 0], sizes = [16, 16], strides = [1, 1]} : vector<16x96xf32> to vector<16x16xf32>
    %81 = vector.shape_cast %80 : vector<16x16xf32> to vector<2x8x16xf32>
    %82 = vector.extract_strided_slice %79 {offsets = [0, 32], sizes = [16, 16], strides = [1, 1]} : vector<16x96xf32> to vector<16x16xf32>
    %83 = vector.shape_cast %82 : vector<16x16xf32> to vector<2x8x16xf32>
    %84 = vector.extract_strided_slice %79 {offsets = [0, 64], sizes = [16, 16], strides = [1, 1]} : vector<16x96xf32> to vector<16x16xf32>
    %85 = vector.shape_cast %84 : vector<16x16xf32> to vector<2x8x16xf32>
    %86 = arith.truncf %81 : vector<2x8x16xf32> to vector<2x8x16xbf16>
    %87 = arith.truncf %83 : vector<2x8x16xf32> to vector<2x8x16xbf16>
    "tpu.trace_start"() <{level = 10 : i32, message = "bqd,bkd->bqk"}> : () -> ()
    %cst_30 = arith.constant dense<0.000000e+00> : vector<2x8x8xf32>
    %88 = tpu.matmul %86, %87, %cst_30 {dimension_numbers = #tpu.dot_dimension_numbers<[2], [2], [1], [1], [0, 0, 0, 1, 1, 1], [0], [0]>} : vector<2x8x16xbf16>, vector<2x8x16xbf16>, vector<2x8x8xf32> -> vector<2x8x8xf32>
    "tpu.trace_stop"() : () -> ()
    %cst_31 = arith.constant 2.500000e-01 : f32
    %89 = vector.broadcast %cst_31 : f32 to vector<2x8x8xf32>
    %90 = arith.mulf %88, %89 : vector<2x8x8xf32>
    %91 = vector.broadcast %70 : vector<2x1x8xf32> to vector<2x8x8xf32>
    %92 = arith.addf %90, %91 : vector<2x8x8xf32>
    %cst_32 = arith.constant dense<0xFF800000> : vector<2x8xf32>
    %93 = vector.multi_reduction <maximumf>, %92, %cst_32 [2] : vector<2x8x8xf32> to vector<2x8xf32>
    %94 = vector.shape_cast %93 : vector<2x8xf32> to vector<2x8x1xf32>
    %95 = vector.broadcast %94 : vector<2x8x1xf32> to vector<2x8x8xf32>
    %96 = arith.subf %92, %95 : vector<2x8x8xf32>
    %97 = math.exp %96 : vector<2x8x8xf32>
    %cst_33 = arith.constant dense<0.000000e+00> : vector<2x8xf32>
    %98 = vector.multi_reduction <add>, %97, %cst_33 [2] : vector<2x8x8xf32> to vector<2x8xf32>
    %99 = vector.shape_cast %98 : vector<2x8xf32> to vector<2x8x1xf32>
    %100 = vector.broadcast %99 : vector<2x8x1xf32> to vector<2x8x8xf32>
    %101 = arith.divf %97, %100 : vector<2x8x8xf32>
    %102 = arith.truncf %101 : vector<2x8x8xf32> to vector<2x8x8xbf16>
    %103 = arith.truncf %85 : vector<2x8x16xf32> to vector<2x8x16xbf16>
    "tpu.trace_start"() <{level = 10 : i32, message = "bqk,bkd->bqd"}> : () -> ()
    %cst_34 = arith.constant dense<0.000000e+00> : vector<2x8x16xf32>
    %104 = tpu.matmul %102, %103, %cst_34 {dimension_numbers = #tpu.dot_dimension_numbers<[2], [1], [1], [2], [0, 0, 0, 1, 1, 2], [0], [0]>} : vector<2x8x8xbf16>, vector<2x8x16xbf16>, vector<2x8x16xf32> -> vector<2x8x16xf32>
    "tpu.trace_stop"() : () -> ()
    %105 = vector.shape_cast %104 : vector<2x8x16xf32> to vector<16x16xf32>
    %106 = vector.extract_strided_slice %79 {offsets = [0, 16], sizes = [16, 16], strides = [1, 1]} : vector<16x96xf32> to vector<16x16xf32>
    %107 = vector.shape_cast %106 : vector<16x16xf32> to vector<2x8x16xf32>
    %108 = vector.extract_strided_slice %79 {offsets = [0, 48], sizes = [16, 16], strides = [1, 1]} : vector<16x96xf32> to vector<16x16xf32>
    %109 = vector.shape_cast %108 : vector<16x16xf32> to vector<2x8x16xf32>
    %110 = vector.extract_strided_slice %79 {offsets = [0, 80], sizes = [16, 16], strides = [1, 1]} : vector<16x96xf32> to vector<16x16xf32>
    %111 = vector.shape_cast %110 : vector<16x16xf32> to vector<2x8x16xf32>
    %112 = arith.truncf %107 : vector<2x8x16xf32> to vector<2x8x16xbf16>
    %113 = arith.truncf %109 : vector<2x8x16xf32> to vector<2x8x16xbf16>
    "tpu.trace_start"() <{level = 10 : i32, message = "bqd,bkd->bqk"}> : () -> ()
    %cst_35 = arith.constant dense<0.000000e+00> : vector<2x8x8xf32>
    %114 = tpu.matmul %112, %113, %cst_35 {dimension_numbers = #tpu.dot_dimension_numbers<[2], [2], [1], [1], [0, 0, 0, 1, 1, 1], [0], [0]>} : vector<2x8x16xbf16>, vector<2x8x16xbf16>, vector<2x8x8xf32> -> vector<2x8x8xf32>
    "tpu.trace_stop"() : () -> ()
    %cst_36 = arith.constant 2.500000e-01 : f32
    %115 = vector.broadcast %cst_36 : f32 to vector<2x8x8xf32>
    %116 = arith.mulf %114, %115 : vector<2x8x8xf32>
    %117 = vector.broadcast %70 : vector<2x1x8xf32> to vector<2x8x8xf32>
    %118 = arith.addf %116, %117 : vector<2x8x8xf32>
    %cst_37 = arith.constant dense<0xFF800000> : vector<2x8xf32>
    %119 = vector.multi_reduction <maximumf>, %118, %cst_37 [2] : vector<2x8x8xf32> to vector<2x8xf32>
    %120 = vector.shape_cast %119 : vector<2x8xf32> to vector<2x8x1xf32>
    %121 = vector.broadcast %120 : vector<2x8x1xf32> to vector<2x8x8xf32>
    %122 = arith.subf %118, %121 : vector<2x8x8xf32>
    %123 = math.exp %122 : vector<2x8x8xf32>
    %cst_38 = arith.constant dense<0.000000e+00> : vector<2x8xf32>
    %124 = vector.multi_reduction <add>, %123, %cst_38 [2] : vector<2x8x8xf32> to vector<2x8xf32>
    %125 = vector.shape_cast %124 : vector<2x8xf32> to vector<2x8x1xf32>
    %126 = vector.broadcast %125 : vector<2x8x1xf32> to vector<2x8x8xf32>
    %127 = arith.divf %123, %126 : vector<2x8x8xf32>
    %128 = arith.truncf %127 : vector<2x8x8xf32> to vector<2x8x8xbf16>
    %129 = arith.truncf %111 : vector<2x8x16xf32> to vector<2x8x16xbf16>
    "tpu.trace_start"() <{level = 10 : i32, message = "bqk,bkd->bqd"}> : () -> ()
    %cst_39 = arith.constant dense<0.000000e+00> : vector<2x8x16xf32>
    %130 = tpu.matmul %128, %129, %cst_39 {dimension_numbers = #tpu.dot_dimension_numbers<[2], [1], [1], [2], [0, 0, 0, 1, 1, 2], [0], [0]>} : vector<2x8x8xbf16>, vector<2x8x16xbf16>, vector<2x8x16xf32> -> vector<2x8x16xf32>
    "tpu.trace_stop"() : () -> ()
    %131 = vector.shape_cast %130 : vector<2x8x16xf32> to vector<16x16xf32>
    %132 = tpu.concatenate %105, %131 in 1 : vector<16x16xf32>, vector<16x16xf32> -> vector<16x32xf32>
    %133 = arith.truncf %132 : vector<16x32xf32> to vector<16x32xbf16>
    %c0_40 = arith.constant 0 : index
    %c0_41 = arith.constant 0 : index
    %c0_42 = arith.constant 0 : index
    %134 = vector.load %arg7[%c0_40, %c0_41, %c0_42] : memref<2x32x32xbf16, #tpu.memory_space<vmem>>, vector<1x32x32xbf16>
    %135 = vector.shape_cast %134 : vector<1x32x32xbf16> to vector<32x32xbf16>
    %cst_43 = arith.constant dense<0.000000e+00> : vector<16x32xf32>
    %136 = tpu.matmul %133, %135, %cst_43 {dimension_numbers = #tpu.dot_dimension_numbers<[1], [0], [0], [1], [0, 0, 1, 1], [], []>} : vector<16x32xbf16>, vector<32x32xbf16>, vector<16x32xf32> -> vector<16x32xf32>
    %137 = vector.extract_strided_slice %72 {offsets = [1, 0], sizes = [1, 32], strides = [1, 1]} : vector<8x128xf32> to vector<1x32xf32>
    %138 = vector.broadcast %137 : vector<1x32xf32> to vector<16x32xf32>
    %139 = arith.addf %136, %138 : vector<16x32xf32>
    %140 = arith.addf %139, %64 : vector<16x32xf32>
    %141 = vector.extract_strided_slice %72 {offsets = [2, 0], sizes = [1, 32], strides = [1, 1]} : vector<8x128xf32> to vector<1x32xf32>
    %142 = vector.extract_strided_slice %72 {offsets = [3, 0], sizes = [1, 32], strides = [1, 1]} : vector<8x128xf32> to vector<1x32xf32>
    %cst_44 = arith.constant dense<0.000000e+00> : vector<16xf32>
    %143 = vector.multi_reduction <add>, %140, %cst_44 [1] : vector<16x32xf32> to vector<16xf32>
    %144 = vector.shape_cast %143 : vector<16xf32> to vector<16x1xf32>
    %cst_45 = arith.constant 3.200000e+01 : f32
    %145 = vector.broadcast %cst_45 : f32 to vector<16x1xf32>
    %146 = arith.divf %144, %145 : vector<16x1xf32>
    %147 = vector.broadcast %146 : vector<16x1xf32> to vector<16x32xf32>
    %148 = arith.subf %140, %147 : vector<16x32xf32>
    %149 = arith.mulf %148, %148 : vector<16x32xf32>
    %cst_46 = arith.constant dense<0.000000e+00> : vector<16xf32>
    %150 = vector.multi_reduction <add>, %149, %cst_46 [1] : vector<16x32xf32> to vector<16xf32>
    %151 = vector.shape_cast %150 : vector<16xf32> to vector<16x1xf32>
    %cst_47 = arith.constant 3.200000e+01 : f32
    %152 = vector.broadcast %cst_47 : f32 to vector<16x1xf32>
    %153 = arith.divf %151, %152 : vector<16x1xf32>
    %154 = vector.broadcast %146 : vector<16x1xf32> to vector<16x32xf32>
    %155 = arith.subf %140, %154 : vector<16x32xf32>
    %cst_48 = arith.constant 9.99999996E-13 : f32
    %156 = vector.broadcast %cst_48 : f32 to vector<16x1xf32>
    %157 = arith.addf %153, %156 : vector<16x1xf32>
    %158 = math.rsqrt %157 : vector<16x1xf32>
    %159 = vector.broadcast %158 : vector<16x1xf32> to vector<16x32xf32>
    %160 = arith.mulf %155, %159 : vector<16x32xf32>
    %161 = vector.broadcast %141 : vector<1x32xf32> to vector<16x32xf32>
    %162 = arith.mulf %160, %161 : vector<16x32xf32>
    %163 = vector.broadcast %142 : vector<1x32xf32> to vector<16x32xf32>
    %164 = arith.addf %162, %163 : vector<16x32xf32>
    %165 = arith.truncf %164 : vector<16x32xf32> to vector<16x32xbf16>
    %c0_49 = arith.constant 0 : index
    %c0_50 = arith.constant 0 : index
    %c0_51 = arith.constant 0 : index
    %166 = vector.load %arg8[%c0_49, %c0_50, %c0_51] : memref<2x32x64xbf16, #tpu.memory_space<vmem>>, vector<1x32x64xbf16>
    %167 = vector.shape_cast %166 : vector<1x32x64xbf16> to vector<32x64xbf16>
    %cst_52 = arith.constant dense<0.000000e+00> : vector<16x64xf32>
    %168 = tpu.matmul %165, %167, %cst_52 {dimension_numbers = #tpu.dot_dimension_numbers<[1], [0], [0], [1], [0, 0, 1, 1], [], []>} : vector<16x32xbf16>, vector<32x64xbf16>, vector<16x64xf32> -> vector<16x64xf32>
    %169 = vector.extract_strided_slice %72 {offsets = [4, 0], sizes = [1, 64], strides = [1, 1]} : vector<8x128xf32> to vector<1x64xf32>
    %170 = vector.broadcast %169 : vector<1x64xf32> to vector<16x64xf32>
    %171 = arith.addf %168, %170 : vector<16x64xf32>
    %cst_53 = arith.constant 5.000000e-01 : f32
    %172 = vector.broadcast %cst_53 : f32 to vector<16x64xf32>
    %173 = arith.mulf %172, %171 : vector<16x64xf32>
    %cst_54 = arith.constant 4.471500e-02 : f32
    %174 = vector.broadcast %cst_54 : f32 to vector<16x64xf32>
    %175 = arith.mulf %174, %171 : vector<16x64xf32>
    %176 = arith.mulf %175, %171 : vector<16x64xf32>
    %177 = arith.mulf %176, %171 : vector<16x64xf32>
    %178 = arith.addf %171, %177 : vector<16x64xf32>
    %cst_55 = arith.constant 0.797884583 : f32
    %179 = vector.broadcast %cst_55 : f32 to vector<16x64xf32>
    %180 = arith.mulf %179, %178 : vector<16x64xf32>
    %181 = math.tanh %180 : vector<16x64xf32>
    %cst_56 = arith.constant 1.000000e+00 : f32
    %182 = vector.broadcast %cst_56 : f32 to vector<16x64xf32>
    %183 = arith.addf %182, %181 : vector<16x64xf32>
    %184 = arith.mulf %173, %183 : vector<16x64xf32>
    %185 = arith.truncf %184 : vector<16x64xf32> to vector<16x64xbf16>
    %c0_57 = arith.constant 0 : index
    %c0_58 = arith.constant 0 : index
    %c0_59 = arith.constant 0 : index
    %186 = vector.load %arg9[%c0_57, %c0_58, %c0_59] : memref<2x64x32xbf16, #tpu.memory_space<vmem>>, vector<1x64x32xbf16>
    %187 = vector.shape_cast %186 : vector<1x64x32xbf16> to vector<64x32xbf16>
    %cst_60 = arith.constant dense<0.000000e+00> : vector<16x32xf32>
    %188 = tpu.matmul %185, %187, %cst_60 {dimension_numbers = #tpu.dot_dimension_numbers<[1], [0], [0], [1], [0, 0, 1, 1], [], []>} : vector<16x64xbf16>, vector<64x32xbf16>, vector<16x32xf32> -> vector<16x32xf32>
    %189 = vector.extract_strided_slice %72 {offsets = [5, 0], sizes = [1, 32], strides = [1, 1]} : vector<8x128xf32> to vector<1x32xf32>
    %190 = vector.broadcast %189 : vector<1x32xf32> to vector<16x32xf32>
    %191 = arith.addf %188, %190 : vector<16x32xf32>
    %192 = arith.addf %191, %164 : vector<16x32xf32>
    %193 = vector.extract_strided_slice %72 {offsets = [6, 0], sizes = [1, 32], strides = [1, 1]} : vector<8x128xf32> to vector<1x32xf32>
    %194 = vector.extract_strided_slice %72 {offsets = [7, 0], sizes = [1, 32], strides = [1, 1]} : vector<8x128xf32> to vector<1x32xf32>
    %cst_61 = arith.constant dense<0.000000e+00> : vector<16xf32>
    %195 = vector.multi_reduction <add>, %192, %cst_61 [1] : vector<16x32xf32> to vector<16xf32>
    %196 = vector.shape_cast %195 : vector<16xf32> to vector<16x1xf32>
    %cst_62 = arith.constant 3.200000e+01 : f32
    %197 = vector.broadcast %cst_62 : f32 to vector<16x1xf32>
    %198 = arith.divf %196, %197 : vector<16x1xf32>
    %199 = vector.broadcast %198 : vector<16x1xf32> to vector<16x32xf32>
    %200 = arith.subf %192, %199 : vector<16x32xf32>
    %201 = arith.mulf %200, %200 : vector<16x32xf32>
    %cst_63 = arith.constant dense<0.000000e+00> : vector<16xf32>
    %202 = vector.multi_reduction <add>, %201, %cst_63 [1] : vector<16x32xf32> to vector<16xf32>
    %203 = vector.shape_cast %202 : vector<16xf32> to vector<16x1xf32>
    %cst_64 = arith.constant 3.200000e+01 : f32
    %204 = vector.broadcast %cst_64 : f32 to vector<16x1xf32>
    %205 = arith.divf %203, %204 : vector<16x1xf32>
    %206 = vector.broadcast %198 : vector<16x1xf32> to vector<16x32xf32>
    %207 = arith.subf %192, %206 : vector<16x32xf32>
    %cst_65 = arith.constant 9.99999996E-13 : f32
    %208 = vector.broadcast %cst_65 : f32 to vector<16x1xf32>
    %209 = arith.addf %205, %208 : vector<16x1xf32>
    %210 = math.rsqrt %209 : vector<16x1xf32>
    %211 = vector.broadcast %210 : vector<16x1xf32> to vector<16x32xf32>
    %212 = arith.mulf %207, %211 : vector<16x32xf32>
    %213 = vector.broadcast %193 : vector<1x32xf32> to vector<16x32xf32>
    %214 = arith.mulf %212, %213 : vector<16x32xf32>
    %215 = vector.broadcast %194 : vector<1x32xf32> to vector<16x32xf32>
    %216 = arith.addf %214, %215 : vector<16x32xf32>
    %c1 = arith.constant 1 : index
    %c0_66 = arith.constant 0 : index
    %c0_67 = arith.constant 0 : index
    %217 = vector.load %arg10[%c1, %c0_66, %c0_67] : memref<2x8x128xf32, #tpu.memory_space<vmem>>, vector<1x8x128xf32>
    %218 = vector.shape_cast %217 : vector<1x8x128xf32> to vector<8x128xf32>
    %219 = arith.truncf %216 : vector<16x32xf32> to vector<16x32xbf16>
    %c1_68 = arith.constant 1 : index
    %c0_69 = arith.constant 0 : index
    %c0_70 = arith.constant 0 : index
    %220 = vector.load %arg6[%c1_68, %c0_69, %c0_70] : memref<2x32x96xbf16, #tpu.memory_space<vmem>>, vector<1x32x96xbf16>
    %221 = vector.shape_cast %220 : vector<1x32x96xbf16> to vector<32x96xbf16>
    %cst_71 = arith.constant dense<0.000000e+00> : vector<16x96xf32>
    %222 = tpu.matmul %219, %221, %cst_71 {dimension_numbers = #tpu.dot_dimension_numbers<[1], [0], [0], [1], [0, 0, 1, 1], [], []>} : vector<16x32xbf16>, vector<32x96xbf16>, vector<16x96xf32> -> vector<16x96xf32>
    %223 = vector.extract_strided_slice %218 {offsets = [0, 0], sizes = [1, 96], strides = [1, 1]} : vector<8x128xf32> to vector<1x96xf32>
    %224 = vector.broadcast %223 : vector<1x96xf32> to vector<16x96xf32>
    %225 = arith.addf %222, %224 : vector<16x96xf32>
    %226 = vector.extract_strided_slice %225 {offsets = [0, 0], sizes = [16, 16], strides = [1, 1]} : vector<16x96xf32> to vector<16x16xf32>
    %227 = vector.shape_cast %226 : vector<16x16xf32> to vector<2x8x16xf32>
    %228 = vector.extract_strided_slice %225 {offsets = [0, 32], sizes = [16, 16], strides = [1, 1]} : vector<16x96xf32> to vector<16x16xf32>
    %229 = vector.shape_cast %228 : vector<16x16xf32> to vector<2x8x16xf32>
    %230 = vector.extract_strided_slice %225 {offsets = [0, 64], sizes = [16, 16], strides = [1, 1]} : vector<16x96xf32> to vector<16x16xf32>
    %231 = vector.shape_cast %230 : vector<16x16xf32> to vector<2x8x16xf32>
    %232 = arith.truncf %227 : vector<2x8x16xf32> to vector<2x8x16xbf16>
    %233 = arith.truncf %229 : vector<2x8x16xf32> to vector<2x8x16xbf16>
    "tpu.trace_start"() <{level = 10 : i32, message = "bqd,bkd->bqk"}> : () -> ()
    %cst_72 = arith.constant dense<0.000000e+00> : vector<2x8x8xf32>
    %234 = tpu.matmul %232, %233, %cst_72 {dimension_numbers = #tpu.dot_dimension_numbers<[2], [2], [1], [1], [0, 0, 0, 1, 1, 1], [0], [0]>} : vector<2x8x16xbf16>, vector<2x8x16xbf16>, vector<2x8x8xf32> -> vector<2x8x8xf32>
    "tpu.trace_stop"() : () -> ()
    %cst_73 = arith.constant 2.500000e-01 : f32
    %235 = vector.broadcast %cst_73 : f32 to vector<2x8x8xf32>
    %236 = arith.mulf %234, %235 : vector<2x8x8xf32>
    %237 = vector.broadcast %70 : vector<2x1x8xf32> to vector<2x8x8xf32>
    %238 = arith.addf %236, %237 : vector<2x8x8xf32>
    %cst_74 = arith.constant dense<0xFF800000> : vector<2x8xf32>
    %239 = vector.multi_reduction <maximumf>, %238, %cst_74 [2] : vector<2x8x8xf32> to vector<2x8xf32>
    %240 = vector.shape_cast %239 : vector<2x8xf32> to vector<2x8x1xf32>
    %241 = vector.broadcast %240 : vector<2x8x1xf32> to vector<2x8x8xf32>
    %242 = arith.subf %238, %241 : vector<2x8x8xf32>
    %243 = math.exp %242 : vector<2x8x8xf32>
    %cst_75 = arith.constant dense<0.000000e+00> : vector<2x8xf32>
    %244 = vector.multi_reduction <add>, %243, %cst_75 [2] : vector<2x8x8xf32> to vector<2x8xf32>
    %245 = vector.shape_cast %244 : vector<2x8xf32> to vector<2x8x1xf32>
    %246 = vector.broadcast %245 : vector<2x8x1xf32> to vector<2x8x8xf32>
    %247 = arith.divf %243, %246 : vector<2x8x8xf32>
    %248 = arith.truncf %247 : vector<2x8x8xf32> to vector<2x8x8xbf16>
    %249 = arith.truncf %231 : vector<2x8x16xf32> to vector<2x8x16xbf16>
    "tpu.trace_start"() <{level = 10 : i32, message = "bqk,bkd->bqd"}> : () -> ()
    %cst_76 = arith.constant dense<0.000000e+00> : vector<2x8x16xf32>
    %250 = tpu.matmul %248, %249, %cst_76 {dimension_numbers = #tpu.dot_dimension_numbers<[2], [1], [1], [2], [0, 0, 0, 1, 1, 2], [0], [0]>} : vector<2x8x8xbf16>, vector<2x8x16xbf16>, vector<2x8x16xf32> -> vector<2x8x16xf32>
    "tpu.trace_stop"() : () -> ()
    %251 = vector.shape_cast %250 : vector<2x8x16xf32> to vector<16x16xf32>
    %252 = vector.extract_strided_slice %225 {offsets = [0, 16], sizes = [16, 16], strides = [1, 1]} : vector<16x96xf32> to vector<16x16xf32>
    %253 = vector.shape_cast %252 : vector<16x16xf32> to vector<2x8x16xf32>
    %254 = vector.extract_strided_slice %225 {offsets = [0, 48], sizes = [16, 16], strides = [1, 1]} : vector<16x96xf32> to vector<16x16xf32>
    %255 = vector.shape_cast %254 : vector<16x16xf32> to vector<2x8x16xf32>
    %256 = vector.extract_strided_slice %225 {offsets = [0, 80], sizes = [16, 16], strides = [1, 1]} : vector<16x96xf32> to vector<16x16xf32>
    %257 = vector.shape_cast %256 : vector<16x16xf32> to vector<2x8x16xf32>
    %258 = arith.truncf %253 : vector<2x8x16xf32> to vector<2x8x16xbf16>
    %259 = arith.truncf %255 : vector<2x8x16xf32> to vector<2x8x16xbf16>
    "tpu.trace_start"() <{level = 10 : i32, message = "bqd,bkd->bqk"}> : () -> ()
    %cst_77 = arith.constant dense<0.000000e+00> : vector<2x8x8xf32>
    %260 = tpu.matmul %258, %259, %cst_77 {dimension_numbers = #tpu.dot_dimension_numbers<[2], [2], [1], [1], [0, 0, 0, 1, 1, 1], [0], [0]>} : vector<2x8x16xbf16>, vector<2x8x16xbf16>, vector<2x8x8xf32> -> vector<2x8x8xf32>
    "tpu.trace_stop"() : () -> ()
    %cst_78 = arith.constant 2.500000e-01 : f32
    %261 = vector.broadcast %cst_78 : f32 to vector<2x8x8xf32>
    %262 = arith.mulf %260, %261 : vector<2x8x8xf32>
    %263 = vector.broadcast %70 : vector<2x1x8xf32> to vector<2x8x8xf32>
    %264 = arith.addf %262, %263 : vector<2x8x8xf32>
    %cst_79 = arith.constant dense<0xFF800000> : vector<2x8xf32>
    %265 = vector.multi_reduction <maximumf>, %264, %cst_79 [2] : vector<2x8x8xf32> to vector<2x8xf32>
    %266 = vector.shape_cast %265 : vector<2x8xf32> to vector<2x8x1xf32>
    %267 = vector.broadcast %266 : vector<2x8x1xf32> to vector<2x8x8xf32>
    %268 = arith.subf %264, %267 : vector<2x8x8xf32>
    %269 = math.exp %268 : vector<2x8x8xf32>
    %cst_80 = arith.constant dense<0.000000e+00> : vector<2x8xf32>
    %270 = vector.multi_reduction <add>, %269, %cst_80 [2] : vector<2x8x8xf32> to vector<2x8xf32>
    %271 = vector.shape_cast %270 : vector<2x8xf32> to vector<2x8x1xf32>
    %272 = vector.broadcast %271 : vector<2x8x1xf32> to vector<2x8x8xf32>
    %273 = arith.divf %269, %272 : vector<2x8x8xf32>
    %274 = arith.truncf %273 : vector<2x8x8xf32> to vector<2x8x8xbf16>
    %275 = arith.truncf %257 : vector<2x8x16xf32> to vector<2x8x16xbf16>
    "tpu.trace_start"() <{level = 10 : i32, message = "bqk,bkd->bqd"}> : () -> ()
    %cst_81 = arith.constant dense<0.000000e+00> : vector<2x8x16xf32>
    %276 = tpu.matmul %274, %275, %cst_81 {dimension_numbers = #tpu.dot_dimension_numbers<[2], [1], [1], [2], [0, 0, 0, 1, 1, 2], [0], [0]>} : vector<2x8x8xbf16>, vector<2x8x16xbf16>, vector<2x8x16xf32> -> vector<2x8x16xf32>
    "tpu.trace_stop"() : () -> ()
    %277 = vector.shape_cast %276 : vector<2x8x16xf32> to vector<16x16xf32>
    %278 = tpu.concatenate %251, %277 in 1 : vector<16x16xf32>, vector<16x16xf32> -> vector<16x32xf32>
    %279 = arith.truncf %278 : vector<16x32xf32> to vector<16x32xbf16>
    %c1_82 = arith.constant 1 : index
    %c0_83 = arith.constant 0 : index
    %c0_84 = arith.constant 0 : index
    %280 = vector.load %arg7[%c1_82, %c0_83, %c0_84] : memref<2x32x32xbf16, #tpu.memory_space<vmem>>, vector<1x32x32xbf16>
    %281 = vector.shape_cast %280 : vector<1x32x32xbf16> to vector<32x32xbf16>
    %cst_85 = arith.constant dense<0.000000e+00> : vector<16x32xf32>
    %282 = tpu.matmul %279, %281, %cst_85 {dimension_numbers = #tpu.dot_dimension_numbers<[1], [0], [0], [1], [0, 0, 1, 1], [], []>} : vector<16x32xbf16>, vector<32x32xbf16>, vector<16x32xf32> -> vector<16x32xf32>
    %283 = vector.extract_strided_slice %218 {offsets = [1, 0], sizes = [1, 32], strides = [1, 1]} : vector<8x128xf32> to vector<1x32xf32>
    %284 = vector.broadcast %283 : vector<1x32xf32> to vector<16x32xf32>
    %285 = arith.addf %282, %284 : vector<16x32xf32>
    %286 = arith.addf %285, %216 : vector<16x32xf32>
    %287 = vector.extract_strided_slice %218 {offsets = [2, 0], sizes = [1, 32], strides = [1, 1]} : vector<8x128xf32> to vector<1x32xf32>
    %288 = vector.extract_strided_slice %218 {offsets = [3, 0], sizes = [1, 32], strides = [1, 1]} : vector<8x128xf32> to vector<1x32xf32>
    %cst_86 = arith.constant dense<0.000000e+00> : vector<16xf32>
    %289 = vector.multi_reduction <add>, %286, %cst_86 [1] : vector<16x32xf32> to vector<16xf32>
    %290 = vector.shape_cast %289 : vector<16xf32> to vector<16x1xf32>
    %cst_87 = arith.constant 3.200000e+01 : f32
    %291 = vector.broadcast %cst_87 : f32 to vector<16x1xf32>
    %292 = arith.divf %290, %291 : vector<16x1xf32>
    %293 = vector.broadcast %292 : vector<16x1xf32> to vector<16x32xf32>
    %294 = arith.subf %286, %293 : vector<16x32xf32>
    %295 = arith.mulf %294, %294 : vector<16x32xf32>
    %cst_88 = arith.constant dense<0.000000e+00> : vector<16xf32>
    %296 = vector.multi_reduction <add>, %295, %cst_88 [1] : vector<16x32xf32> to vector<16xf32>
    %297 = vector.shape_cast %296 : vector<16xf32> to vector<16x1xf32>
    %cst_89 = arith.constant 3.200000e+01 : f32
    %298 = vector.broadcast %cst_89 : f32 to vector<16x1xf32>
    %299 = arith.divf %297, %298 : vector<16x1xf32>
    %300 = vector.broadcast %292 : vector<16x1xf32> to vector<16x32xf32>
    %301 = arith.subf %286, %300 : vector<16x32xf32>
    %cst_90 = arith.constant 9.99999996E-13 : f32
    %302 = vector.broadcast %cst_90 : f32 to vector<16x1xf32>
    %303 = arith.addf %299, %302 : vector<16x1xf32>
    %304 = math.rsqrt %303 : vector<16x1xf32>
    %305 = vector.broadcast %304 : vector<16x1xf32> to vector<16x32xf32>
    %306 = arith.mulf %301, %305 : vector<16x32xf32>
    %307 = vector.broadcast %287 : vector<1x32xf32> to vector<16x32xf32>
    %308 = arith.mulf %306, %307 : vector<16x32xf32>
    %309 = vector.broadcast %288 : vector<1x32xf32> to vector<16x32xf32>
    %310 = arith.addf %308, %309 : vector<16x32xf32>
    %311 = arith.truncf %310 : vector<16x32xf32> to vector<16x32xbf16>
    %c1_91 = arith.constant 1 : index
    %c0_92 = arith.constant 0 : index
    %c0_93 = arith.constant 0 : index
    %312 = vector.load %arg8[%c1_91, %c0_92, %c0_93] : memref<2x32x64xbf16, #tpu.memory_space<vmem>>, vector<1x32x64xbf16>
    %313 = vector.shape_cast %312 : vector<1x32x64xbf16> to vector<32x64xbf16>
    %cst_94 = arith.constant dense<0.000000e+00> : vector<16x64xf32>
    %314 = tpu.matmul %311, %313, %cst_94 {dimension_numbers = #tpu.dot_dimension_numbers<[1], [0], [0], [1], [0, 0, 1, 1], [], []>} : vector<16x32xbf16>, vector<32x64xbf16>, vector<16x64xf32> -> vector<16x64xf32>
    %315 = vector.extract_strided_slice %218 {offsets = [4, 0], sizes = [1, 64], strides = [1, 1]} : vector<8x128xf32> to vector<1x64xf32>
    %316 = vector.broadcast %315 : vector<1x64xf32> to vector<16x64xf32>
    %317 = arith.addf %314, %316 : vector<16x64xf32>
    %cst_95 = arith.constant 5.000000e-01 : f32
    %318 = vector.broadcast %cst_95 : f32 to vector<16x64xf32>
    %319 = arith.mulf %318, %317 : vector<16x64xf32>
    %cst_96 = arith.constant 4.471500e-02 : f32
    %320 = vector.broadcast %cst_96 : f32 to vector<16x64xf32>
    %321 = arith.mulf %320, %317 : vector<16x64xf32>
    %322 = arith.mulf %321, %317 : vector<16x64xf32>
    %323 = arith.mulf %322, %317 : vector<16x64xf32>
    %324 = arith.addf %317, %323 : vector<16x64xf32>
    %cst_97 = arith.constant 0.797884583 : f32
    %325 = vector.broadcast %cst_97 : f32 to vector<16x64xf32>
    %326 = arith.mulf %325, %324 : vector<16x64xf32>
    %327 = math.tanh %326 : vector<16x64xf32>
    %cst_98 = arith.constant 1.000000e+00 : f32
    %328 = vector.broadcast %cst_98 : f32 to vector<16x64xf32>
    %329 = arith.addf %328, %327 : vector<16x64xf32>
    %330 = arith.mulf %319, %329 : vector<16x64xf32>
    %331 = arith.truncf %330 : vector<16x64xf32> to vector<16x64xbf16>
    %c1_99 = arith.constant 1 : index
    %c0_100 = arith.constant 0 : index
    %c0_101 = arith.constant 0 : index
    %332 = vector.load %arg9[%c1_99, %c0_100, %c0_101] : memref<2x64x32xbf16, #tpu.memory_space<vmem>>, vector<1x64x32xbf16>
    %333 = vector.shape_cast %332 : vector<1x64x32xbf16> to vector<64x32xbf16>
    %cst_102 = arith.constant dense<0.000000e+00> : vector<16x32xf32>
    %334 = tpu.matmul %331, %333, %cst_102 {dimension_numbers = #tpu.dot_dimension_numbers<[1], [0], [0], [1], [0, 0, 1, 1], [], []>} : vector<16x64xbf16>, vector<64x32xbf16>, vector<16x32xf32> -> vector<16x32xf32>
    %335 = vector.extract_strided_slice %218 {offsets = [5, 0], sizes = [1, 32], strides = [1, 1]} : vector<8x128xf32> to vector<1x32xf32>
    %336 = vector.broadcast %335 : vector<1x32xf32> to vector<16x32xf32>
    %337 = arith.addf %334, %336 : vector<16x32xf32>
    %338 = arith.addf %337, %310 : vector<16x32xf32>
    %339 = vector.extract_strided_slice %218 {offsets = [6, 0], sizes = [1, 32], strides = [1, 1]} : vector<8x128xf32> to vector<1x32xf32>
    %340 = vector.extract_strided_slice %218 {offsets = [7, 0], sizes = [1, 32], strides = [1, 1]} : vector<8x128xf32> to vector<1x32xf32>
    %cst_103 = arith.constant dense<0.000000e+00> : vector<16xf32>
    %341 = vector.multi_reduction <add>, %338, %cst_103 [1] : vector<16x32xf32> to vector<16xf32>
    %342 = vector.shape_cast %341 : vector<16xf32> to vector<16x1xf32>
    %cst_104 = arith.constant 3.200000e+01 : f32
    %343 = vector.broadcast %cst_104 : f32 to vector<16x1xf32>
    %344 = arith.divf %342, %343 : vector<16x1xf32>
    %345 = vector.broadcast %344 : vector<16x1xf32> to vector<16x32xf32>
    %346 = arith.subf %338, %345 : vector<16x32xf32>
    %347 = arith.mulf %346, %346 : vector<16x32xf32>
    %cst_105 = arith.constant dense<0.000000e+00> : vector<16xf32>
    %348 = vector.multi_reduction <add>, %347, %cst_105 [1] : vector<16x32xf32> to vector<16xf32>
    %349 = vector.shape_cast %348 : vector<16xf32> to vector<16x1xf32>
    %cst_106 = arith.constant 3.200000e+01 : f32
    %350 = vector.broadcast %cst_106 : f32 to vector<16x1xf32>
    %351 = arith.divf %349, %350 : vector<16x1xf32>
    %352 = vector.broadcast %344 : vector<16x1xf32> to vector<16x32xf32>
    %353 = arith.subf %338, %352 : vector<16x32xf32>
    %cst_107 = arith.constant 9.99999996E-13 : f32
    %354 = vector.broadcast %cst_107 : f32 to vector<16x1xf32>
    %355 = arith.addf %351, %354 : vector<16x1xf32>
    %356 = math.rsqrt %355 : vector<16x1xf32>
    %357 = vector.broadcast %356 : vector<16x1xf32> to vector<16x32xf32>
    %358 = arith.mulf %353, %357 : vector<16x32xf32>
    %359 = vector.broadcast %339 : vector<1x32xf32> to vector<16x32xf32>
    %360 = arith.mulf %358, %359 : vector<16x32xf32>
    %361 = vector.broadcast %340 : vector<1x32xf32> to vector<16x32xf32>
    %362 = arith.addf %360, %361 : vector<16x32xf32>
    %363 = vector.shape_cast %362 : vector<16x32xf32> to vector<2x8x32xf32>
    %364 = vector.extract_strided_slice %363 {offsets = [0, 0, 0], sizes = [2, 1, 32], strides = [1, 1, 1]} : vector<2x8x32xf32> to vector<2x1x32xf32>
    %365 = vector.shape_cast %364 : vector<2x1x32xf32> to vector<2x32xf32>
    %366 = vector.extract_strided_slice %363 {offsets = [0, 1, 0], sizes = [2, 1, 32], strides = [1, 1, 1]} : vector<2x8x32xf32> to vector<2x1x32xf32>
    %367 = vector.shape_cast %366 : vector<2x1x32xf32> to vector<2x32xf32>
    %368 = vector.extract_strided_slice %363 {offsets = [0, 2, 0], sizes = [2, 1, 32], strides = [1, 1, 1]} : vector<2x8x32xf32> to vector<2x1x32xf32>
    %369 = vector.shape_cast %368 : vector<2x1x32xf32> to vector<2x32xf32>
    %370 = vector.extract_strided_slice %363 {offsets = [0, 3, 0], sizes = [2, 1, 32], strides = [1, 1, 1]} : vector<2x8x32xf32> to vector<2x1x32xf32>
    %371 = vector.shape_cast %370 : vector<2x1x32xf32> to vector<2x32xf32>
    %372 = vector.extract_strided_slice %363 {offsets = [0, 4, 0], sizes = [2, 1, 32], strides = [1, 1, 1]} : vector<2x8x32xf32> to vector<2x1x32xf32>
    %373 = vector.shape_cast %372 : vector<2x1x32xf32> to vector<2x32xf32>
    %374 = vector.extract_strided_slice %363 {offsets = [0, 5, 0], sizes = [2, 1, 32], strides = [1, 1, 1]} : vector<2x8x32xf32> to vector<2x1x32xf32>
    %375 = vector.shape_cast %374 : vector<2x1x32xf32> to vector<2x32xf32>
    %376 = vector.extract_strided_slice %363 {offsets = [0, 6, 0], sizes = [2, 1, 32], strides = [1, 1, 1]} : vector<2x8x32xf32> to vector<2x1x32xf32>
    %377 = vector.shape_cast %376 : vector<2x1x32xf32> to vector<2x32xf32>
    %378 = vector.extract_strided_slice %363 {offsets = [0, 7, 0], sizes = [2, 1, 32], strides = [1, 1, 1]} : vector<2x8x32xf32> to vector<2x1x32xf32>
    %379 = vector.shape_cast %378 : vector<2x1x32xf32> to vector<2x32xf32>
    %380 = tpu.concatenate %365, %367, %369, %371, %373, %375, %377, %379 in 1 : vector<2x32xf32>, vector<2x32xf32>, vector<2x32xf32>, vector<2x32xf32>, vector<2x32xf32>, vector<2x32xf32>, vector<2x32xf32>, vector<2x32xf32> -> vector<2x256xf32>
    %381 = vector.shape_cast %380 : vector<2x256xf32> to vector<2x1x256xf32>
    %c0_108 = arith.constant 0 : index
    %c0_109 = arith.constant 0 : index
    %c0_110 = arith.constant 0 : index
    %382 = vector.load %arg11[%c0_108, %c0_109, %c0_110] : memref<2x1x256xf32, #tpu.memory_space<vmem>>, vector<2x1x256xf32>
    tpu.vector_store %arg11[%c0_108, %c0_109, %c0_110], %381 {strides = array<i32>} : memref<2x1x256xf32, #tpu.memory_space<vmem>>, vector<2x1x256xf32>,
    return
  }
  func.func @transform_0(%arg0: i32) -> (i32, i32, i32) {
    %c0_i32 = arith.constant 0 : i32
    %c0_i32_0 = arith.constant 0 : i32
    %c0_i32_1 = arith.constant 0 : i32
    return %arg0, %c0_i32, %c0_i32_0 : i32, i32, i32
  }
  func.func @transform_1(%arg0: i32) -> (i32, i32, i32) {
    %c0_i32 = arith.constant 0 : i32
    %c0_i32_0 = arith.constant 0 : i32
    %c0_i32_1 = arith.constant 0 : i32
    return %arg0, %c0_i32, %c0_i32_0 : i32, i32, i32
  }
  func.func @transform_2(%arg0: i32) -> (i32, i32) {
    %c0_i32 = arith.constant 0 : i32
    %c0_i32_0 = arith.constant 0 : i32
    %c0_i32_1 = arith.constant 0 : i32
    return %c0_i32, %c0_i32_0 : i32, i32
  }
  func.func @transform_3(%arg0: i32) -> (i32, i32) {
    %c0_i32 = arith.constant 0 : i32
    %c0_i32_0 = arith.constant 0 : i32
    %c0_i32_1 = arith.constant 0 : i32
    return %c0_i32, %c0_i32_0 : i32, i32
  }
  func.func @transform_4(%arg0: i32) -> (i32, i32) {
    %c0_i32 = arith.constant 0 : i32
    %c0_i32_0 = arith.constant 0 : i32
    %c0_i32_1 = arith.constant 0 : i32
    return %c0_i32, %c0_i32_0 : i32, i32
  }
  func.func @transform_5(%arg0: i32) -> (i32, i32, i32) {
    %c0_i32 = arith.constant 0 : i32
    %c0_i32_0 = arith.constant 0 : i32
    %c0_i32_1 = arith.constant 0 : i32
    %c0_i32_2 = arith.constant 0 : i32
    return %c0_i32, %c0_i32_0, %c0_i32_1 : i32, i32, i32
  }
  func.func @transform_6(%arg0: i32) -> (i32, i32, i32) {
    %c0_i32 = arith.constant 0 : i32
    %c0_i32_0 = arith.constant 0 : i32
    %c0_i32_1 = arith.constant 0 : i32
    %c0_i32_2 = arith.constant 0 : i32
    return %c0_i32, %c0_i32_0, %c0_i32_1 : i32, i32, i32
  }
  func.func @transform_7(%arg0: i32) -> (i32, i32, i32) {
    %c0_i32 = arith.constant 0 : i32
    %c0_i32_0 = arith.constant 0 : i32
    %c0_i32_1 = arith.constant 0 : i32
    %c0_i32_2 = arith.constant 0 : i32
    return %c0_i32, %c0_i32_0, %c0_i32_1 : i32, i32, i32
  }
  func.func @transform_8(%arg0: i32) -> (i32, i32, i32) {
    %c0_i32 = arith.constant 0 : i32
    %c0_i32_0 = arith.constant 0 : i32
    %c0_i32_1 = arith.constant 0 : i32
    %c0_i32_2 = arith.constant 0 : i32
    return %c0_i32, %c0_i32_0, %c0_i32_1 : i32, i32, i32
  }
  func.func @transform_9(%arg0: i32) -> (i32, i32, i32) {
    %c0_i32 = arith.constant 0 : i32
    %c0_i32_0 = arith.constant 0 : i32
    %c0_i32_1 = arith.constant 0 : i32
    %c0_i32_2 = arith.constant 0 : i32
    return %c0_i32, %c0_i32_0, %c0_i32_1 : i32, i32, i32
  }
  func.func @transform_10(%arg0: i32) -> (i32, i32, i32) {
    %c0_i32 = arith.constant 0 : i32
    %c0_i32_0 = arith.constant 0 : i32
    %c0_i32_1 = arith.constant 0 : i32
    return %arg0, %c0_i32, %c0_i32_0 : i32, i32, i32
  }
}

</mosaic_0001>

<bundles_post_ra>
// kernel: tpu_custom_call.1
= control target key start
LH: loop header
LB: loop body
LE: loop exit
PB: predicated region body
PF: predicated region fallthrough
CT: control target
= control target key end

     0   :  { %v2696_v2 = vmov 0   ;;  %v2697_v3 = vmov 1   ;;  %v2698_v14 = vmov 2   ;;  %v2699_v18 = vmov 3   ;;  %s3273_s0 = inlined_call_operand.vmem [shape: s32[2,8,4], index: 0, kind: input, shape index: {}]   ;;  %s3274_s1 = inlined_call_operand.vmem [shape: s32[2,1,8], index: 1, kind: input, shape index: {}]   ;;  %s3275_s2 = inlined_call_operand.vmem [shape: bf16[256,32], index: 2, kind: input, shape index: {}]   ;;  %s3276_s3 = inlined_call_operand.vmem [shape: bf16[16,32], index: 3, kind: input, shape index: {}]   ;;  %s3277_s4 = inlined_call_operand.vmem [shape: f32[8,128], index: 4, kind: input, shape index: {}]   ;;  %s3278_s5 = inlined_call_operand.vmem [shape: bf16[2,32,96], index: 5, kind: input, shape index: {}]   ;;  %s3279_s6 = inlined_call_operand.vmem [shape: bf16[2,32,32], index: 6, kind: input, shape index: {}]   ;;  %s3280_s7 = inlined_call_operand.vmem [shape: bf16[2,32,64], index: 7, kind: input, shape index: {}]   ;;  %s3281_s8 = inlined_call_operand.vmem [shape: bf16[2,64,32], index: 8, kind: input, shape index: {}]   ;;  %s3282_s9 = inlined_call_operand.vmem [shape: f32[2,8,128], index: 9, kind: input, shape index: {}]   ;;  %s3283_s10 = inlined_call_operand.hbm [shape: f32[2,1,256], index: 10, kind: output, shape index: {}]  }
   0x1   :  { %v37_v0 = vld [vmem:[%s3273_s0] sm:$0xff]  ;;  %v38_v1 = vld [vmem:[%s3273_s0 + $0x8] sm:$0xff]  ;;  %2555 = vset.pattern.permute.xlu0 %v2696_v2  ;;  %2556 = vset.pattern.permute.xlu1 %v2697_v3  ;;  %v2575_v10 = vld [vmem:[%s3275_s2 + $0x50] sm:$0xff]   ;;  %v2700_v22 = vmov 0.0   ;;  %vm3284_vm0 = vmmov 0  }
   0x2   :  { %v52_v4 = vadd.s32 100, %v37_v0  ;;  %43 = vperm.xlu0 %2555, %v37_v0   ;;  %v2571_v5 = vld [vmem:[%s3275_s2 + $0x40] sm:$0xff]   ;;  %v53_v6 = vadd.s32 100, %v38_v1  ;;  %v2573_v8 = vld [vmem:[%s3275_s2 + $0x48] sm:$0xff]   ;;  %v68_v11 = vadd.s32 150, %v37_v0  ;;  %v69_v12 = vadd.s32 150, %v38_v1  ;;  %2364 = vmatprep.subr.bf16.mxu0 %v2700_v22 }
   0x3   :  { %v2572_v7 = vld [vmem:[%s3275_s2] sm:$0xff]   ;;  %2282 = vmatprep.subr.bf16.mxu1 %v2571_v5  ;;  %v2574_v9 = vld [vmem:[%s3275_s2 + $0x8] sm:$0xff]   ;;  %v2576_v13 = vld [vmem:[%s3275_s2 + $0x10] sm:$0xff]   ;;  %2366 = vmatprep.mubr.msk.bf16.mxu0 %vm3284_vm0, %v2700_v22 }
   0x4   :  { %55 = vperm.xlu1 %2556, %v52_v4   ;;  %2283 = vmatpush3.bf16.msra.mxu1 %v2572_v7  ;;  %v2577_v15 = vld [vmem:[%s3275_s2 + $0x58] sm:$0xff]   ;;  %v2579_v17 = vld [vmem:[%s3275_s2 + $0x60] sm:$0xff]   ;;  %v2581_v20 = vld [vmem:[%s3275_s2 + $0x68] sm:$0xff]  }
   0x5   :  { %2284 = vmatprep.subr.bf16.mxu1 %v2573_v8  ;;  %v2578_v16 = vld [vmem:[%s3275_s2 + $0x18] sm:$0xff]   ;;  %v2580_v19 = vld [vmem:[%s3275_s2 + $0x20] sm:$0xff]   ;;  %v2582_v21 = vld [vmem:[%s3275_s2 + $0x28] sm:$0xff]  }
   0x6   :  { %46 = vperm.xlu0 %2555, %v38_v1   ;;  %v2587_v23 = vld [vmem:[%s3276_s3] sm:$0xff]   ;;  %v2583_v24 = vld [vmem:[%s3275_s2 + $0x70] sm:$0xff]   ;;  %v2585_v26 = vld [vmem:[%s3275_s2 + $0x78] sm:$0xff]  }
   0x7   :  { %2365 = vmatpush3.bf16.msra.mxu0 %v2587_v23  ;;  %v2584_v25 = vld [vmem:[%s3275_s2 + $0x30] sm:$0xff]   ;;  %v2586_v27 = vld [vmem:[%s3275_s2 + $0x38] sm:$0xff]  }
   0x8   :  { %58 = vperm.xlu1 %2556, %v53_v6   ;;  %2285 = vmatpush3.bf16.msra.mxu1 %v2574_v9 }
   0x9   :  { %2286 = vmatprep.subr.bf16.mxu1 %v2575_v10  ;;  %2370 = vmatprep.subr.bf16.mxu0 %v2700_v22 }
   0xa   :  { %2557 = vset.pattern.permute.xlu0 %v2698_v14 }
   0xb   :  { %71 = vperm.xlu0 %2557, %v68_v11  }
   0xc   :  { %2558 = vset.pattern.permute.xlu1 %v2698_v14  ;;  %2287 = vmatpush3.bf16.msra.mxu1 %v2576_v13 }
   0xd   :  { %74 = vperm.xlu1 %2558, %v69_v12   ;;  %2288 = vmatprep.subr.bf16.mxu1 %v2577_v15 }
   0xf   :  { %2560 = vset.pattern.permute.xlu0 %v2699_v18 }
  0x10   :  { %136 = vperm.xlu0 %2560, %v38_v1   ;;  %2289 = vmatpush3.bf16.msra.mxu1 %v2578_v16 }
  0x11   :  { %2559 = vset.pattern.permute.xlu1 %v2699_v18  ;;  %2290 = vmatprep.subr.bf16.mxu1 %v2579_v17 }
  0x12   :  { %133 = vperm.xlu1 %2559, %v37_v0  }
  0x14   :  { %2291 = vmatpush3.bf16.msra.mxu1 %v2580_v19 }
  0x15   :  { %2292 = vmatprep.subr.bf16.mxu1 %v2581_v20 }
  0x18   :  { %2293 = vmatpush3.bf16.msra.mxu1 %v2582_v21 }
  0x19   :  { %2294 = vmatprep.subr.bf16.mxu1 %v2583_v24 }
  0x1c   :  { %2295 = vmatpush3.bf16.msra.mxu1 %v2584_v25 }
  0x1d   :  { %2296 = vmatprep.subr.bf16.mxu1 %v2585_v26 }
  0x20   :  { %2297 = vmatpush3.bf16.msra.mxu1 %v2586_v27 }
  0x21   :  { %15 = vsyncpa [#allocation3], 0  ;;  %2408 = vmatprep.subr.bf16.mxu1 %v2700_v22  ;;  %v39_v28 = vlaneseq  ;;  %v2702_v40 = vmov 1.0|1.0   ;;  %v202_v46 = vld [vmem:[%s3277_s4] sm:$0xff]  ;;  %v2589_v13 = vld [vmem:[%s3278_s5 + $0x8] sm:$0xff]  }
  0x22   :  { %v2588_v12 = vld [vmem:[%s3278_s5] sm:$0xff]   ;;  %s2703_s14 = smov 96   ;;  %s2705_s19 = smov 80  }
  0x23   :  { %v40_v29 = vand.u32 127, %v39_v28  ;;  %v2845_v44 = vshrl.u32 %v39_v28, 7  ;;  %s2706_s20 = smov 112   ;;  %s2707_s21 = smov 48  }
  0x24   :  { %s2708_s25 = smov 16  }
  0x25   :  { %v41_v31 = vadd.s32 128, %v40_v29  ;;  %v2848_v45 = vsub.s32 0, %v2845_v44  ;;  %v2867_v20 = vsub.s32 1, %v2845_v44  ;;  %v2871_v23 = vsub.s32 2, %v2845_v44 }
  0x27   :  { %v206_v48 = vrot.slane %v202_v46, %v2848_v45  ;;  %v383_v21 = vrot.slane %v202_v46, %v2867_v20  ;;  %v389_v27 = vrot.slane %v202_v46, %v2871_v23 }
  0x81   :  { %v44_v30 = vpop.permute.xlu0 %43 }
  0x82   :  { %vm48_vm1 = vcmp.eq.s32.totalorder %v40_v29, %v44_v30  ;;  %vm49_vm3 = vcmp.eq.s32.totalorder %v41_v31, %v44_v30 }
  0x83   :  { %v56_v32 = vpop.permute.xlu1 %55 }
  0x84   :  { %vm60_vm2 = vcmp.eq.s32.totalorder %v40_v29, %v56_v32  ;;  %vm61_vm4 = vcmp.eq.s32.totalorder %v41_v31, %v56_v32 }
  0x85   :  { %v47_v33 = vpop.permute.xlu0 %46  ;;  %vm64_vm7 = vmor %vm48_vm1, %vm60_vm2 }
  0x86   :  { %vm50_vm5 = vcmp.eq.s32.totalorder %v40_v29, %v47_v33  ;;  %vm51_vm8 = vcmp.eq.s32.totalorder %v41_v31, %v47_v33  ;;  %vm65_vm10 = vmor %vm49_vm3, %vm61_vm4 }
  0x87   :  { %v59_v34 = vpop.permute.xlu1 %58 }
  0x88   :  { %vm62_vm6 = vcmp.eq.s32.totalorder %v40_v29, %v59_v34  ;;  %vm63_vm9 = vcmp.eq.s32.totalorder %v41_v31, %v59_v34 }
  0x89   :  { %vm66_vm11 = vmor %vm50_vm5, %vm62_vm6 }
  0x8a   :  { %v72_v35 = vpop.permute.xlu0 %71  ;;  %vm67_vm14 = vmor %vm51_vm8, %vm63_vm9  ;;  %vm157_vm9 = vcmask 130048  }
  0x8b   :  { %vm76_vm12 = vcmp.eq.s32.totalorder %v40_v29, %v72_v35  ;;  %vm77_vm13 = vcmp.eq.s32.totalorder %v41_v31, %v72_v35  ;;  %v2886_v35 = vld [vmem:[%s3282_s9] sm:$0xff] }
  0x8c   :  { %v75_v36 = vpop.permute.xlu1 %74  ;;  %vm2831_vm15 = vmor %vm64_vm7, %vm76_vm12  ;;  %vm612_vm12 = vcmask 1043456  }
  0x8d   :  { %vm78_vm0 = vcmp.eq.s32.totalorder %v40_v29, %v75_v36  ;;  %vm79_vm1 = vcmp.eq.s32.totalorder %v41_v31, %v75_v36  ;;  %vm81_vm3 = vmor %vm65_vm10, %vm77_vm13  ;;  %vm352_vm10 = vcmask 261120   ;;  %v409_v36 = vrot.slane %v2886_v35, %v2848_v45 }
  0x8e   :  { %vm82_vm2 = vmor %vm66_vm11, %vm78_vm0  ;;  %vm3288_vm0 = vmmov 0   ;;  %vm582_vm11 = vcmask 64512   ;;  %vm1163_vm13 = vcmask 523264  }
  0x8f   :  { %vm83_vm4 = vmor %vm67_vm14, %vm79_vm1  ;;  %v137_v38 = vpop.permute.xlu0 %136  ;;  %vm2089_vm14 = vcmask 1041409   ;;  %vm2167_vm1 = vcmp.lt.s32.totalorder %v39_v28, 256 }
  0x90   :  { %vm2276_vm5 = vmpackc.low %vm83_vm4, %vm81_vm3  ;;  %vm139_vm6 = vcmp.eq.s32.totalorder %v40_v29, %v137_v38 }
  0x91   :  { %v134_v39 = vpop.permute.xlu1 %133  ;;  %2277 = vmatprep.mubr.msk.bf16.mxu1 %vm2276_vm5, %v2702_v40  ;;  %vm2278_vm8 = vmpackc.low %vm82_vm2, %vm2831_vm15  ;;  %v141_v41 = vsel %vm139_vm6, 1.0, %v2700_v22  ;;  %vm2133_vm15 = vcmask 785408  }
  0x92   :  { %vm138_vm7 = vcmp.eq.s32.totalorder %v40_v29, %v134_v39  ;;  %2279 = vmatmul.mubr.msk.bf16.vlgmr.msra.gmra.mrb[0].mxu1 %vm2278_vm8, %v2702_v40 }
  0x93   :  { %v140_v42 = vsel %vm138_vm7, 1.0, %v2700_v22  ;;  %2410 = vmatprep.mubr.msk.bf16.mxu1 %vm3288_vm0, %v2700_v22 }
  0x94   :  { %v2273_v43 = vpack.c.bf16 %v141_v41, %v140_v42 }
  0x96   :  { %2367 = vmatmul.mubr.msk.bf16.vlgmr.msra.gmra.mrb[0].mxu0 %vm157_vm9, %v2273_v43 }
  0x97   :  { %2374 = vmatprep.mubr.msk.bf16.mxu0 %vm3288_vm0, %v2700_v22  ;;  %2371 = vmatpush3.bf16.msra.mxu0 %v2588_v12 }
  0x98   :  { %2372 = vmatprep.subr.bf16.mxu0 %v2700_v22 }
  0x9b   :  { %2373 = vmatpush3.bf16.msra.mxu0 %v2589_v13 }
  0x9c   :  { %2378 = vmatprep.subr.bf16.mxu0 %v2700_v22 }
 0x165   :  { %v2298_v47 = vpop.f32.mrb[0].mxu1 }
 0x166   :  { %v2299_v49 = vpop.f32.mrb[1].mxu1 }
 0x167   :  { %v2300_v50 = vadd.f32 %v2299_v49, %v2298_v47  ;;  %v2301_v51 = vpop.f32.mrb[2].mxu1 }
 0x168   :  { %v2302_v52 = vpop.f32.mrb[3].mxu1 }
 0x169   :  { %v195_v53 = vpop.f32.mrb[0].mxu0  ;;  %v342_v54 = vadd.f32 %v2300_v50, %v206_v48  ;;  %v2303_v55 = vadd.f32 %v2302_v52, %v2301_v51  ;;  %v392_v51 = vld [vmem:[%s3274_s1] sm:$0x1] }
 0x16a   :  { %v2368_v56 = vpop.f32.mrb[1].mxu0  ;;  %v394_v52 = vcvt.s32.f32 %v392_v51 }
 0x16b   :  { %v198_v57 = vpop.f32.mrb[2].mxu0  ;;  %2608 = vtanh.f32 %v342_v54  ;;  %v345_v58 = vadd.f32 %v2303_v55, %v206_v48  ;;  %v393_v54 = vld [vmem:[%s3274_s1 + $0x1] sm:$0x1]  ;;  %s2704_s1 = smov 64  }
 0x16c   :  { %v2369_v59 = vpop.f32.mrb[3].mxu0  ;;  %v395_v56 = vcvt.s32.f32 %v393_v54 }
 0x16d   :  { %2610 = vtanh.f32 %v345_v58 }
 0x16e   :  { %v397_v58 = vsub.f32 1.0, %v395_v56 }
 0x175   :  { %v2609_v60 = vpop.eup %2608 }
 0x176   :  { %v350_v61 = vadd.f32 %v2609_v60, %v195_v53  ;;  %v396_v53 = vsub.f32 1.0, %v394_v52 }
 0x177   :  { %v2611_v62 = vpop.eup %2610 }
 0x178   :  { %v351_v63 = vadd.f32 %v2611_v62, %v198_v57  ;;  %v353_v0 = vsel %vm352_vm10, %v350_v61, 0.0  ;;  %v398_v55 = vmul.f32 -10000.0, %v396_v53 }
 0x179   :  { %354 = vadd.xlane.f32.xlu1 %v353_v0 }
 0x17a   :  { %v356_v1 = vsel %vm352_vm10, %v351_v63, 0.0  ;;  %v2917_v57 = vrot.slane %v398_v55, %v2848_v45 }
 0x17b   :  { %357 = vadd.xlane.f32.xlu0 %v356_v1  ;;  %v399_v1 = vmul.f32 -10000.0, %v397_v58 }
 0x206   :  { %v355_v2 = vpop.xlane.xlu1 %354 }
 0x207   :  { %v360_v3 = vmul.f32 0.03125, %v355_v2 }
 0x208   :  { %v358_v4 = vpop.xlane.xlu0 %357 }
 0x209   :  { %v362_v5 = vsub.f32 %v350_v61, %v360_v3  ;;  %v361_v6 = vmul.f32 0.03125, %v358_v4  ;;  %v2922_v3 = vrot.slane %v399_v1, %v2848_v45 }
 0x20b   :  { %v363_v7 = vsub.f32 %v351_v63, %v361_v6  ;;  %v364_v8 = vmul.f32 %v362_v5, %v362_v5 }
 0x20d   :  { %v366_v9 = vsel %vm352_vm10, %v364_v8, 0.0  ;;  %v365_v10 = vmul.f32 %v363_v7, %v363_v7 }
 0x20e   :  { %367 = vadd.xlane.f32.xlu1 %v366_v9 }
 0x20f   :  { %v369_v11 = vsel %vm352_vm10, %v365_v10, 0.0 }
 0x210   :  { %370 = vadd.xlane.f32.xlu0 %v369_v11 }
 0x29b   :  { %v368_v14 = vpop.xlane.xlu1 %367 }
 0x29c   :  { %v372_v15 = vmul.f32 0.03125, %v368_v14 }
 0x29d   :  { %v371_v16 = vpop.xlane.xlu0 %370 }
 0x29e   :  { %v374_v17 = vadd.f32 1e-12, %v372_v15  ;;  %v373_v18 = vmul.f32 0.03125, %v371_v16 }
 0x2a0   :  { %2612 = vrsqrt.f32 %v374_v17  ;;  %v375_v19 = vadd.f32 1e-12, %v373_v18 }
 0x2a2   :  { %2614 = vrsqrt.f32 %v375_v19 }
 0x2aa   :  { %v2613_v24 = vpop.eup %2612 }
 0x2ab   :  { %v378_v25 = vmul.f32 %v2613_v24, %v362_v5 }
 0x2ac   :  { %v2615_v26 = vpop.eup %2614 }
 0x2ad   :  { %v384_v29 = vmul.f32 %v383_v21, %v378_v25  ;;  %v379_v30 = vmul.f32 %v2615_v26, %v363_v7 }
 0x2af   :  { %v385_v31 = vmul.f32 %v383_v21, %v379_v30  ;;  %v2874_v32 = vadd.f32 %v389_v27, %v384_v29 }
 0x2b1   :  { %v2876_v33 = vadd.f32 %v389_v27, %v385_v31 }
 0x2b3   :  { %v401_v34 = vpack.c.bf16 %v2876_v33, %v2874_v32 }
 0x2b5   :  { %2375 = vmatmul.mubr.msk.bf16.vlgmr.msra.gmra.mrb[4].mxu0 %vm352_vm10, %v401_v34 }
 0x2b6   :  { %2380 = vmatprep.mubr.msk.bf16.mxu0 %vm3288_vm0, %v2700_v22 }
 0x388   :  { %v459_v37 = vpop.f32.mrb[4].mxu0 }
 0x389   :  { %v460_v38 = vadd.f32 %v459_v37, %v409_v36  ;;  %v2376_v39 = vpop.f32.mrb[5].mxu0 }
 0x38a   :  { %v462_v40 = vpop.f32.mrb[6].mxu0 }
 0x38b   :  { %v2890_v41 = vpack.c.bf16 %v460_v38, %v460_v38  ;;  %v463_v42 = vadd.f32 %v462_v40, %v409_v36  ;;  %v2377_v43 = vpop.f32.mrb[7].mxu0 }
 0x38d   :  { %v2892_v46 = vpack.c.bf16 %v463_v42, %v463_v42  ;;  %469 = vrot.lane.b32.xlu1 %v2890_v41, %s2703_s14 }
 0x38f   :  { %518 = vrot.lane.b32.xlu0 %v2892_v46, %s2703_s14 }
 0x3ff   :  { %v470_v47 = vpop.permute.xlu1 %469 }
 0x400   :  { %v475_v48 = vsel %vm157_vm9, %v470_v47, 0 }
 0x401   :  { %2379 = vmatpush3.bf16.xpose.msra.mxu0 %v475_v48  ;;  %v519_v49 = vpop.permute.xlu0 %518 }
 0x402   :  { %2384 = vmatprep.subr.bf16.mxu0 %v2700_v22  ;;  %v524_v50 = vsel %vm157_vm9, %v519_v49, 0 }
 0x408   :  { %2381 = vmatmul.mubr.msk.bf16.vlgmr.msra.gmra.mrb[8].mxu0 %vm157_vm9, %v2890_v41 }
 0x409   :  { %2385 = vmatpush3.bf16.xpose.msra.mxu0 %v524_v50  ;;  %2386 = vmatprep.mubr.msk.bf16.mxu0 %vm3288_vm0, %v2700_v22 }
 0x40a   :  { %2390 = vmatprep.subr.bf16.mxu0 %v2700_v22 }
 0x410   :  { %2387 = vmatmul.mubr.msk.bf16.vlgmr.msra.gmra.mrb[12].mxu0 %vm157_vm9, %v2892_v46 }
 0x411   :  { %2392 = vmatprep.mubr.msk.bf16.mxu0 %vm3288_vm0, %v2700_v22 }
 0x4db   :  { %v511_v59 = vpop.f32.mrb[8].mxu0 }
 0x4dc   :  { %v566_v60 = vmul.f32 0.25, %v511_v59  ;;  %v2382_v61 = vpop.f32.mrb[9].mxu0 }
 0x4dd   :  { %v514_v62 = vpop.f32.mrb[10].mxu0 }
 0x4de   :  { %v2383_v63 = vpop.f32.mrb[11].mxu0  ;;  %v580_v0 = vadd.f32 %v2917_v57, %v566_v60 }
 0x4e0   :  { %v583_v2 = vsel %vm582_vm11, %v580_v0, -inf }
 0x4e1   :  { %584 = vmax.xlane.f32.xlu1 %v583_v2 }
 0x4e3   :  { %v560_v4 = vpop.f32.mrb[12].mxu0 }
 0x4e4   :  { %v567_v5 = vmul.f32 0.25, %v560_v4  ;;  %v2388_v6 = vpop.f32.mrb[13].mxu0 }
 0x4e5   :  { %v563_v7 = vpop.f32.mrb[14].mxu0 }
 0x4e6   :  { %v2389_v8 = vpop.f32.mrb[15].mxu0  ;;  %v581_v9 = vadd.f32 %v2922_v3, %v567_v5 }
 0x4e8   :  { %v586_v10 = vsel %vm582_vm11, %v581_v9, -inf }
 0x4e9   :  { %587 = vmax.xlane.f32.xlu0 %v586_v10 }
 0x4f2   :  { %607 = vrot.lane.b32.xlu1 %v2890_v41, %s2704_s1 }
 0x56e   :  { %v585_v11 = vpop.xlane.xlu1 %584 }
 0x56f   :  { %v589_v12 = vsub.f32 %v580_v0, %v585_v11 }
 0x571   :  { %v591_v13 = vmul.f32 1.442695, %v589_v12 }
 0x572   :  { %v608_v14 = vpop.permute.xlu1 %607 }
 0x573   :  { %2616 = vpow2.f32 %v591_v13  ;;  %v614_v15 = vsel %vm612_vm12, %v608_v14, 0 }
 0x574   :  { %2391 = vmatpush3.bf16.msra.mxu0 %v614_v15 }
 0x575   :  { %2396 = vmatprep.subr.bf16.mxu0 %v2700_v22 }
 0x576   :  { %v588_v16 = vpop.xlane.xlu0 %587 }
 0x577   :  { %v590_v17 = vsub.f32 %v581_v9, %v588_v16 }
 0x579   :  { %v593_v18 = vmul.f32 1.442695, %v590_v17 }
 0x57b   :  { %2618 = vpow2.f32 %v593_v18 }
 0x57d   :  { %v2617_v19 = vpop.eup %2616 }
 0x57e   :  { %v595_v21 = vsel %vm582_vm11, %v2617_v19, 0.0 }
 0x57f   :  { %596 = vadd.xlane.f32.xlu1 %v595_v21 }
 0x585   :  { %v2619_v24 = vpop.eup %2618 }
 0x586   :  { %v598_v25 = vsel %vm582_vm11, %v2619_v24, 0.0 }
 0x587   :  { %599 = vadd.xlane.f32.xlu0 %v598_v25 }
 0x590   :  { %706 = vrot.lane.b32.xlu1 %v2890_v41, %s2705_s19 }
 0x594   :  { %756 = vrot.lane.b32.xlu1 %v2892_v46, %s2705_s19 }
 0x598   :  { %754 = vrot.lane.b32.xlu1 %v2892_v46, %s2706_s20 }
 0x59d   :  { %656 = vrot.lane.b32.xlu0 %v2892_v46, %s2704_s1 }
 0x5a1   :  { %704 = vrot.lane.b32.xlu0 %v2890_v41, %s2706_s20 }
 0x60c   :  { %v597_v26 = vpop.xlane.xlu1 %596 }
 0x60d   :  { %2620 = vrcp.f32 %v597_v26 }
 0x610   :  { %v707_v27 = vpop.permute.xlu1 %706 }
 0x611   :  { %v712_v48 = vsel %vm157_vm9, %v707_v27, 0 }
 0x614   :  { %v757_v29 = vpop.permute.xlu1 %756  ;;  %v600_v30 = vpop.xlane.xlu0 %599 }
 0x615   :  { %v762_v31 = vsel %vm157_vm9, %v757_v29, 0  ;;  %2622 = vrcp.f32 %v600_v30 }
 0x616   :  { %2409 = vmatpush3.bf16.xpose.msra.mxu1 %v762_v31 }
 0x617   :  { %v2621_v34 = vpop.eup %2620  ;;  %2420 = vmatprep.subr.bf16.mxu1 %v2700_v22 }
 0x618   :  { %v602_v36 = vmul.f32 %v2621_v34, %v2617_v19  ;;  %v657_v37 = vpop.permute.xlu0 %656  ;;  %v755_v39 = vpop.permute.xlu1 %754 }
 0x619   :  { %v662_v40 = vsel %vm612_vm12, %v657_v37, 0  ;;  %v2590_v37 = vld [vmem:[%s3279_s6] sm:$0xff]  }
 0x61a   :  { %v605_v38 = vpack.c.bf16 %v602_v36, %v602_v36 }
 0x61c   :  { %2393 = vmatmul.mubr.msk.bf16.vlgmr.msra.gmra.mrb[16].mxu0 %vm582_vm11, %v605_v38  ;;  %v705_v49 = vpop.permute.xlu0 %704  ;;  %v2591_v38 = vld [vmem:[%s3279_s6 + $0x8] sm:$0xff]  }
 0x61d   :  { %2397 = vmatpush3.bf16.msra.mxu0 %v662_v40  ;;  %2411 = vmatmul.mubr.msk.bf16.vlgmr.msra.gmra.mrb[4].mxu1 %vm157_vm9, %v755_v39 }
 0x61e   :  { %2398 = vmatprep.mubr.msk.bf16.mxu0 %vm3288_vm0, %v2700_v22  ;;  %2402 = vmatprep.subr.bf16.mxu0 %v2700_v22 }
 0x61f   :  { %v2623_v42 = vpop.eup %2622  ;;  %2422 = vmatprep.mubr.msk.bf16.mxu1 %vm3288_vm0, %v2700_v22 }
 0x620   :  { %v604_v43 = vmul.f32 %v2623_v42, %v2619_v24 }
 0x622   :  { %v606_v47 = vpack.c.bf16 %v604_v43, %v604_v43 }
 0x624   :  { %2399 = vmatmul.mubr.msk.bf16.vlgmr.msra.gmra.mrb[20].mxu0 %vm582_vm11, %v606_v47 }
 0x625   :  { %2404 = vmatprep.mubr.msk.bf16.mxu0 %vm3288_vm0, %v2700_v22 }
 0x626   :  { %2403 = vmatpush3.bf16.xpose.msra.mxu0 %v712_v48 }
 0x627   :  { %2414 = vmatprep.subr.bf16.mxu0 %v2700_v22 }
 0x62d   :  { %2405 = vmatmul.mubr.msk.bf16.vlgmr.msra.gmra.mrb[24].mxu0 %vm157_vm9, %v705_v49 }
 0x62e   :  { %2416 = vmatprep.mubr.msk.bf16.mxu0 %vm3288_vm0, %v2700_v22 }
 0x6ef   :  { %v2960_v50 = vpop.f32.mrb[16].mxu0 }
 0x6f0   :  { %v2394_v51 = vpop.f32.mrb[17].mxu0  ;;  %v798_v52 = vpop.f32.mrb[4].mxu1 }
 0x6f1   :  { %v805_v53 = vmul.f32 0.25, %v798_v52  ;;  %v653_v54 = vpop.f32.mrb[18].mxu0  ;;  %v2412_v55 = vpop.f32.mrb[5].mxu1 }
 0x6f2   :  { %v2395_v56 = vpop.f32.mrb[19].mxu0  ;;  %v801_v58 = vpop.f32.mrb[6].mxu1 }
 0x6f3   :  { %v2413_v59 = vpop.f32.mrb[7].mxu1  ;;  %v807_v60 = vadd.f32 %v805_v53, %v2922_v3 }
 0x6f5   :  { %v811_v61 = vsel %vm582_vm11, %v807_v60, -inf }
 0x6f6   :  { %812 = vmax.xlane.f32.xlu1 %v811_v61 }
 0x6f7   :  { %v2964_v62 = vpop.f32.mrb[20].mxu0 }
 0x6f8   :  { %v2400_v63 = vpop.f32.mrb[21].mxu0 }
 0x6f9   :  { %v701_v0 = vpop.f32.mrb[22].mxu0 }
 0x6fa   :  { %v2401_v1 = vpop.f32.mrb[23].mxu0 }
 0x700   :  { %v748_v2 = vpop.f32.mrb[24].mxu0 }
 0x701   :  { %v804_v4 = vmul.f32 0.25, %v748_v2  ;;  %v2406_v5 = vpop.f32.mrb[25].mxu0 }
 0x702   :  { %v751_v6 = vpop.f32.mrb[26].mxu0 }
 0x703   :  { %v2407_v7 = vpop.f32.mrb[27].mxu0  ;;  %v806_v8 = vadd.f32 %v804_v4, %v2917_v57 }
 0x705   :  { %v808_v9 = vsel %vm582_vm11, %v806_v8, -inf }
 0x706   :  { %809 = vmax.xlane.f32.xlu0 %v808_v9 }
 0x707   :  { %832 = vrot.lane.b32.xlu1 %v2890_v41, %s2707_s21 }
 0x783   :  { %v813_v10 = vpop.xlane.xlu1 %812 }
 0x784   :  { %v815_v11 = vsub.f32 %v807_v60, %v813_v10  ;;  %v946_v60 = vrot.slane %v2886_v35, %v2867_v20 }
 0x786   :  { %v818_v12 = vmul.f32 1.442695, %v815_v11 }
 0x787   :  { %v833_v13 = vpop.permute.xlu1 %832 }
 0x788   :  { %2624 = vpow2.f32 %v818_v12  ;;  %v838_v14 = vsel %vm612_vm12, %v833_v13, 0 }
 0x789   :  { %2415 = vmatpush3.bf16.msra.mxu0 %v838_v14 }
 0x78a   :  { %2426 = vmatprep.subr.bf16.mxu0 %v2700_v22 }
 0x792   :  { %v2625_v15 = vpop.eup %2624 }
 0x793   :  { %v810_v16 = vpop.xlane.xlu0 %809  ;;  %v823_v17 = vsel %vm582_vm11, %v2625_v15, 0.0 }
 0x794   :  { %v814_v18 = vsub.f32 %v806_v8, %v810_v16  ;;  %824 = vadd.xlane.f32.xlu0 %v823_v17  ;;  %v2593_v16 = vld [vmem:[%s3280_s7 + $0x8] sm:$0xff]  }
 0x796   :  { %v816_v19 = vmul.f32 1.442695, %v814_v18 }
 0x798   :  { %2626 = vpow2.f32 %v816_v19 }
 0x7a2   :  { %v2627_v21 = vpop.eup %2626 }
 0x7a3   :  { %v820_v41 = vsel %vm582_vm11, %v2627_v21, 0.0 }
 0x7a4   :  { %821 = vadd.xlane.f32.xlu0 %v820_v41 }
 0x7ba   :  { %880 = vrot.lane.b32.xlu0 %v2892_v46, %s2707_s21 }
 0x821   :  { %v825_v24 = vpop.xlane.xlu0 %824 }
 0x822   :  { %2628 = vrcp.f32 %v825_v24 }
 0x82c   :  { %v2629_v25 = vpop.eup %2628 }
 0x82d   :  { %v829_v27 = vmul.f32 %v2629_v25, %v2625_v15  ;;  %v1034_v25 = vrot.slane %v2886_v35, %v2871_v23 }
 0x82f   :  { %v831_v31 = vpack.c.bf16 %v829_v27, %v829_v27 }
 0x831   :  { %v822_v26 = vpop.xlane.xlu0 %821 }
 0x832   :  { %2630 = vrcp.f32 %v822_v26  ;;  %v1039_v26 = vsub.s32 3, %v2845_v44 }
 0x835   :  { %v881_v29 = vpop.permute.xlu0 %880 }
 0x836   :  { %v886_v30 = vsel %vm612_vm12, %v881_v29, 0 }
 0x837   :  { %2421 = vmatpush3.bf16.msra.mxu1 %v886_v30 }
 0x838   :  { %2434 = vmatprep.subr.bf16.mxu1 %v2700_v22 }
 0x83a   :  { %2423 = vmatmul.mubr.msk.bf16.vlgmr.msra.gmra.mrb[8].mxu1 %vm582_vm11, %v831_v31 }
 0x83b   :  { %2438 = vmatprep.mubr.msk.bf16.mxu1 %vm3288_vm0, %v2700_v22 }
 0x83c   :  { %v2631_v34 = vpop.eup %2630 }
 0x83d   :  { %v827_v46 = vmul.f32 %v2631_v34, %v2627_v21 }
 0x83f   :  { %v830_v36 = vpack.c.bf16 %v827_v46, %v827_v46  ;;  %v1040_v46 = vrot.slane %v2886_v35, %v1039_v26 }
 0x841   :  { %2417 = vmatmul.mubr.msk.bf16.vlgmr.msra.gmra.mrb[28].mxu0 %vm582_vm11, %v830_v36 }
 0x842   :  { %2430 = vmatprep.mubr.msk.bf16.mxu0 %vm3288_vm0, %v2700_v22  ;;  %2427 = vmatpush3.bf16.msra.mxu0 %v2590_v37 }
 0x843   :  { %2428 = vmatprep.subr.bf16.mxu0 %v2700_v22 }
 0x846   :  { %2429 = vmatpush3.bf16.msra.mxu0 %v2591_v38 }
 0x847   :  { %2442 = vmatprep.subr.bf16.mxu0 %v2700_v22 }
 0x90d   :  { %v922_v39 = vpop.f32.mrb[8].mxu1 }
 0x90e   :  { %v2424_v40 = vpop.f32.mrb[9].mxu1 }
 0x90f   :  { %v925_v42 = vpop.f32.mrb[10].mxu1  ;;  %v2594_v40 = vld [vmem:[%s3281_s8] sm:$0xff]  }
 0x910   :  { %v2425_v43 = vpop.f32.mrb[11].mxu1  ;;  %v2595_v42 = vld [vmem:[%s3281_s8 + $0x8] sm:$0xff]  }
 0x911   :  { %v2596_v43 = vld [vmem:[%s3281_s8 + $0x10] sm:$0xff]  }
 0x914   :  { %v874_v47 = vpop.f32.mrb[28].mxu0 }
 0x915   :  { %v2561_v48 = vpack.i.bf16 %v922_v39, %v874_v47  ;;  %v2418_v49 = vpop.f32.mrb[29].mxu0  ;;  %v2597_v47 = vld [vmem:[%s3281_s8 + $0x18] sm:$0xff]  }
 0x916   :  { %v877_v51 = vpop.f32.mrb[30].mxu0 }
 0x917   :  { %2562 = vrot.lane.b32.xlu1 %v2561_v48, %s2708_s25  ;;  %v2419_v52 = vpop.f32.mrb[31].mxu0  ;;  %v1050_v48 = vsub.s32 4, %v2845_v44 }
 0x919   :  { %v1051_v49 = vrot.slane %v2886_v35, %v1050_v48 }
 0x989   :  { %v2563_v53 = vpop.permute.xlu1 %2562 }
 0x98a   :  { %v2565_v54 = vunpack.i.h.bf16 %v2563_v53  ;;  %v2564_v55 = vunpack.i.l.bf16 %v2563_v53 }
 0x98c   :  { %v937_v56 = vsel %vm157_vm9, %v2964_v62, %v2565_v54  ;;  %v936_v58 = vsel %vm157_vm9, %v2960_v50, %v2564_v55 }
 0x98d   :  { %v938_v59 = vpack.c.bf16 %v937_v56, %v936_v58 }
 0x98f   :  { %2431 = vmatmul.mubr.msk.bf16.vlgmr.msra.gmra.mrb[32].mxu0 %vm352_vm10, %v938_v59 }
 0x990   :  { %2450 = vmatprep.mubr.msk.bf16.mxu0 %vm3288_vm0, %v2700_v22  ;;  %2443 = vmatpush3.bf16.msra.mxu0 %v2594_v40  ;;  %v2599_v40 = vld [vmem:[%s3278_s5 + $0x18] sm:$0xff]  }
 0x991   :  { %2444 = vmatprep.subr.bf16.mxu0 %v2700_v22 }
 0x994   :  { %2445 = vmatpush3.bf16.msra.mxu0 %v2595_v42 }
 0x995   :  { %2446 = vmatprep.subr.bf16.mxu0 %v2700_v22 }
 0x998   :  { %2447 = vmatpush3.bf16.msra.mxu0 %v2596_v43 }
 0x999   :  { %2448 = vmatprep.subr.bf16.mxu0 %v2700_v22 }
 0x99c   :  { %2449 = vmatpush3.bf16.msra.mxu0 %v2597_v47 }
 0x99d   :  { %2468 = vmatprep.subr.bf16.mxu0 %v2700_v22 }
 0xa62   :  { %v996_v61 = vpop.f32.mrb[32].mxu0 }
 0xa63   :  { %v997_v63 = vadd.f32 %v996_v61, %v946_v60  ;;  %v2432_v0 = vpop.f32.mrb[33].mxu0 }
 0xa64   :  { %v999_v1 = vpop.f32.mrb[34].mxu0 }
 0xa65   :  { %v1000_v2 = vadd.f32 %v999_v1, %v946_v60  ;;  %v2433_v4 = vpop.f32.mrb[35].mxu0  ;;  %v1003_v62 = vadd.f32 %v997_v63, %v2874_v32 }
 0xa67   :  { %v1005_v5 = vsel %vm352_vm10, %v1003_v62, 0.0  ;;  %v1004_v50 = vadd.f32 %v1000_v2, %v2876_v33  ;;  %v2592_v33 = vld [vmem:[%s3280_s7] sm:$0xff]  }
 0xa68   :  { %1006 = vadd.xlane.f32.xlu1 %v1005_v5  ;;  %2435 = vmatpush3.bf16.msra.mxu1 %v2592_v33 }
 0xa69   :  { %v1008_v6 = vsel %vm352_vm10, %v1004_v50, 0.0  ;;  %2436 = vmatprep.subr.bf16.mxu1 %v2700_v22 }
 0xa6a   :  { %1009 = vadd.xlane.f32.xlu0 %v1008_v6 }
 0xa6c   :  { %2437 = vmatpush3.bf16.msra.mxu1 %v2593_v16 }
 0xa6d   :  { %2454 = vmatprep.subr.bf16.mxu1 %v2700_v22 }
 0xaf5   :  { %v1007_v7 = vpop.xlane.xlu1 %1006 }
 0xaf6   :  { %v1011_v8 = vmul.f32 0.03125, %v1007_v7 }
 0xaf7   :  { %v1010_v9 = vpop.xlane.xlu0 %1009 }
 0xaf8   :  { %v1013_v10 = vsub.f32 %v1003_v62, %v1011_v8  ;;  %v1012_v11 = vmul.f32 0.03125, %v1010_v9 }
 0xafa   :  { %v1014_v12 = vsub.f32 %v1004_v50, %v1012_v11  ;;  %v1015_v13 = vmul.f32 %v1013_v10, %v1013_v10 }
 0xafc   :  { %v1017_v14 = vsel %vm352_vm10, %v1015_v13, 0.0  ;;  %v1016_v15 = vmul.f32 %v1014_v12, %v1014_v12  ;;  %v1137_v13 = vsub.s32 5, %v2845_v44 }
 0xafd   :  { %1018 = vadd.xlane.f32.xlu0 %v1017_v14 }
 0xafe   :  { %v1020_v32 = vsel %vm352_vm10, %v1016_v15, 0.0  ;;  %v1138_v14 = vrot.slane %v2886_v35, %v1137_v13 }
 0xaff   :  { %1021 = vadd.xlane.f32.xlu1 %v1020_v32 }
 0xb8a   :  { %v1019_v17 = vpop.xlane.xlu0 %1018 }
 0xb8b   :  { %v1023_v18 = vmul.f32 0.03125, %v1019_v17 }
 0xb8c   :  { %v1022_v19 = vpop.xlane.xlu1 %1021 }
 0xb8d   :  { %v1025_v21 = vadd.f32 1e-12, %v1023_v18  ;;  %v1024_v41 = vmul.f32 0.03125, %v1022_v19 }
 0xb8f   :  { %2632 = vrsqrt.f32 %v1025_v21  ;;  %v1026_v24 = vadd.f32 1e-12, %v1024_v41 }
 0xb91   :  { %2634 = vrsqrt.f32 %v1026_v24 }
 0xb99   :  { %v2633_v27 = vpop.eup %2632 }
 0xb9a   :  { %v1029_v29 = vmul.f32 %v2633_v27, %v1013_v10 }
 0xb9b   :  { %v2635_v30 = vpop.eup %2634 }
 0xb9c   :  { %v1035_v31 = vmul.f32 %v1034_v25, %v1029_v29  ;;  %v1030_v34 = vmul.f32 %v2635_v30, %v1014_v12 }
 0xb9e   :  { %v1036_v36 = vmul.f32 %v1034_v25, %v1030_v34  ;;  %v1041_v37 = vadd.f32 %v1040_v46, %v1035_v31 }
 0xba0   :  { %v1042_v38 = vadd.f32 %v1040_v46, %v1036_v36 }
 0xba2   :  { %v1043_v39 = vpack.c.bf16 %v1042_v38, %v1041_v37 }
 0xba4   :  { %2439 = vmatmul.mubr.msk.bf16.vlgmr.msra.gmra.mrb[12].mxu1 %vm352_vm10, %v1043_v39 }
 0xba5   :  { %2458 = vmatprep.mubr.msk.bf16.mxu1 %vm3288_vm0, %v2700_v22 }
 0xc77   :  { %v1101_v51 = vpop.f32.mrb[12].mxu1 }
 0xc78   :  { %v1102_v52 = vadd.f32 %v1101_v51, %v1051_v49  ;;  %v2440_v53 = vpop.f32.mrb[13].mxu1 }
 0xc79   :  { %v1104_v54 = vpop.f32.mrb[14].mxu1  ;;  %v1238_v53 = vsub.s32 6, %v2845_v44 }
 0xc7a   :  { %v1110_v55 = vmul.f32 0.044715, %v1102_v52  ;;  %v1105_v56 = vadd.f32 %v1104_v54, %v1051_v49  ;;  %v2441_v58 = vpop.f32.mrb[15].mxu1  ;;  %v1108_v7 = vmul.f32 0.5, %v1102_v52 }
 0xc7b   :  { %v1239_v54 = vrot.slane %v2886_v35, %v1238_v53 }
 0xc7c   :  { %v1112_v59 = vmul.f32 %v1110_v55, %v1102_v52  ;;  %v1111_v60 = vmul.f32 0.044715, %v1105_v56  ;;  %v1109_v8 = vmul.f32 0.5, %v1105_v56  ;;  %v1244_v55 = vsub.s32 7, %v2845_v44 }
 0xc7e   :  { %v1114_v61 = vmul.f32 %v1112_v59, %v1102_v52  ;;  %v1113_v63 = vmul.f32 %v1111_v60, %v1105_v56 }
 0xc80   :  { %v1116_v0 = vadd.f32 %v1114_v61, %v1102_v52  ;;  %v1115_v1 = vmul.f32 %v1113_v63, %v1105_v56  ;;  %v1245_v63 = vrot.slane %v2886_v35, %v1244_v55 }
 0xc82   :  { %v1118_v2 = vmul.f32 0.7978846, %v1116_v0  ;;  %v1117_v4 = vadd.f32 %v1115_v1, %v1105_v56 }
 0xc84   :  { %2636 = vtanh.f32 %v1118_v2  ;;  %v1119_v62 = vmul.f32 0.7978846, %v1117_v4 }
 0xc86   :  { %2638 = vtanh.f32 %v1119_v62  ;;  %v3084_v62 = vld [vmem:[%s3282_s9 + $0x8] sm:$0xff] }
 0xc87   :  { %v1259_v35 = vrot.slane %v3084_v62, %v2848_v45 }
 0xc8e   :  { %v2637_v5 = vpop.eup %2636 }
 0xc8f   :  { %v1122_v50 = vadd.f32 1.0, %v2637_v5 }
 0xc90   :  { %v2639_v6 = vpop.eup %2638 }
 0xc91   :  { %v1123_v9 = vadd.f32 1.0, %v2639_v6  ;;  %v1124_v10 = vmul.f32 %v1122_v50, %v1108_v7 }
 0xc93   :  { %v1125_v11 = vmul.f32 %v1123_v9, %v1109_v8 }
 0xc95   :  { %v1126_v12 = vpack.c.bf16 %v1125_v11, %v1124_v10 }
 0xc97   :  { %2451 = vmatmul.mubr.msk.bf16.vlgmr.msra.gmra.mrb[36].mxu0 %vm1163_vm13, %v1126_v12 }
 0xc98   :  { %2470 = vmatprep.mubr.msk.bf16.mxu0 %vm3288_vm0, %v2700_v22 }
 0xd6a   :  { %v1201_v15 = vpop.f32.mrb[36].mxu0 }
 0xd6b   :  { %v1202_v32 = vadd.f32 %v1201_v15, %v1138_v14  ;;  %v2452_v33 = vpop.f32.mrb[37].mxu0 }
 0xd6c   :  { %v1204_v16 = vpop.f32.mrb[38].mxu0 }
 0xd6d   :  { %v1205_v17 = vadd.f32 %v1204_v16, %v1138_v14  ;;  %v2453_v18 = vpop.f32.mrb[39].mxu0  ;;  %v1208_v19 = vadd.f32 %v1202_v32, %v1041_v37 }
 0xd6f   :  { %v1210_v21 = vsel %vm352_vm10, %v1208_v19, 0.0  ;;  %v1209_v41 = vadd.f32 %v1205_v17, %v1042_v38  ;;  %v2598_v38 = vld [vmem:[%s3278_s5 + $0x10] sm:$0xff]  }
 0xd70   :  { %1211 = vadd.xlane.f32.xlu0 %v1210_v21  ;;  %2455 = vmatpush3.bf16.msra.mxu1 %v2598_v38 }
 0xd71   :  { %v1213_v24 = vsel %vm352_vm10, %v1209_v41, 0.0  ;;  %2456 = vmatprep.subr.bf16.mxu1 %v2700_v22 }
 0xd72   :  { %1214 = vadd.xlane.f32.xlu1 %v1213_v24 }
 0xd74   :  { %2457 = vmatpush3.bf16.msra.mxu1 %v2599_v40 }
 0xd75   :  { %2462 = vmatprep.subr.bf16.mxu1 %v2700_v22 }
 0xdfd   :  { %v1212_v25 = vpop.xlane.xlu0 %1211 }
 0xdfe   :  { %v1216_v27 = vmul.f32 0.03125, %v1212_v25 }
 0xdff   :  { %v1215_v29 = vpop.xlane.xlu1 %1214 }
 0xe00   :  { %v1218_v30 = vsub.f32 %v1208_v19, %v1216_v27  ;;  %v1217_v31 = vmul.f32 0.03125, %v1215_v29 }
 0xe02   :  { %v1219_v34 = vsub.f32 %v1209_v41, %v1217_v31  ;;  %v1220_v46 = vmul.f32 %v1218_v30, %v1218_v30 }
 0xe04   :  { %v1222_v36 = vsel %vm352_vm10, %v1220_v46, 0.0  ;;  %v1221_v39 = vmul.f32 %v1219_v34, %v1219_v34 }
 0xe05   :  { %1223 = vadd.xlane.f32.xlu0 %v1222_v36 }
 0xe06   :  { %v1225_v37 = vsel %vm352_vm10, %v1221_v39, 0.0 }
 0xe07   :  { %1226 = vadd.xlane.f32.xlu1 %v1225_v37 }
 0xe92   :  { %v1224_v42 = vpop.xlane.xlu0 %1223 }
 0xe93   :  { %v1228_v43 = vmul.f32 0.03125, %v1224_v42 }
 0xe94   :  { %v1227_v47 = vpop.xlane.xlu1 %1226 }
 0xe95   :  { %v1230_v49 = vadd.f32 1e-12, %v1228_v43  ;;  %v1229_v51 = vmul.f32 0.03125, %v1227_v47 }
 0xe97   :  { %2640 = vrsqrt.f32 %v1230_v49  ;;  %v1231_v52 = vadd.f32 1e-12, %v1229_v51 }
 0xe99   :  { %2642 = vrsqrt.f32 %v1231_v52 }
 0xea1   :  { %v2641_v56 = vpop.eup %2640 }
 0xea2   :  { %v1234_v58 = vmul.f32 %v2641_v56, %v1218_v30 }
 0xea3   :  { %v2643_v59 = vpop.eup %2642 }
 0xea4   :  { %v1240_v60 = vmul.f32 %v1239_v54, %v1234_v58  ;;  %v1235_v61 = vmul.f32 %v2643_v59, %v1219_v34 }
 0xea6   :  { %v1241_v0 = vmul.f32 %v1239_v54, %v1235_v61  ;;  %v3072_v1 = vadd.f32 %v1245_v63, %v1240_v60 }
 0xea8   :  { %v3074_v2 = vadd.f32 %v1245_v63, %v1241_v0 }
 0xeaa   :  { %v1250_v4 = vpack.c.bf16 %v3074_v2, %v3072_v1 }
 0xeac   :  { %2459 = vmatmul.mubr.msk.bf16.vlgmr.msra.gmra.mrb[16].mxu1 %vm352_vm10, %v1250_v4 }
 0xead   :  { %2464 = vmatprep.mubr.msk.bf16.mxu1 %vm3288_vm0, %v2700_v22 }
 0xf7f   :  { %v1309_v5 = vpop.f32.mrb[16].mxu1 }
 0xf80   :  { %v1310_v50 = vadd.f32 %v1309_v5, %v1259_v35  ;;  %v2460_v6 = vpop.f32.mrb[17].mxu1 }
 0xf81   :  { %v1312_v7 = vpop.f32.mrb[18].mxu1 }
 0xf82   :  { %v3088_v8 = vpack.c.bf16 %v1310_v50, %v1310_v50  ;;  %v1313_v9 = vadd.f32 %v1312_v7, %v1259_v35  ;;  %v2461_v10 = vpop.f32.mrb[19].mxu1 }
 0xf84   :  { %v3090_v11 = vpack.c.bf16 %v1313_v9, %v1313_v9  ;;  %1319 = vrot.lane.b32.xlu0 %v3088_v8, %s2703_s14 }
 0xf86   :  { %1368 = vrot.lane.b32.xlu1 %v3090_v11, %s2703_s14 }
 0xff6   :  { %v1320_v12 = vpop.permute.xlu0 %1319 }
 0xff7   :  { %v1325_v14 = vsel %vm157_vm9, %v1320_v12, 0 }
 0xff8   :  { %2463 = vmatpush3.bf16.xpose.msra.mxu1 %v1325_v14  ;;  %v1369_v45 = vpop.permute.xlu1 %1368 }
 0xff9   :  { %v1374_v15 = vsel %vm157_vm9, %v1369_v45, 0  ;;  %2474 = vmatprep.subr.bf16.mxu1 %v2700_v22 }
 0xffa   :  { %2469 = vmatpush3.bf16.xpose.msra.mxu0 %v1374_v15 }
 0xffb   :  { %2480 = vmatprep.subr.bf16.mxu0 %v2700_v22 }
 0xfff   :  { %2465 = vmatmul.mubr.msk.bf16.vlgmr.msra.gmra.mrb[20].mxu1 %vm157_vm9, %v3088_v8 }
0x1000   :  { %2476 = vmatprep.mubr.msk.bf16.mxu1 %vm3288_vm0, %v2700_v22 }
0x1001   :  { %2471 = vmatmul.mubr.msk.bf16.vlgmr.msra.gmra.mrb[40].mxu0 %vm157_vm9, %v3090_v11 }
0x1002   :  { %2482 = vmatprep.mubr.msk.bf16.mxu0 %vm3288_vm0, %v2700_v22 }
0x10d2   :  { %v1361_v32 = vpop.f32.mrb[20].mxu1 }
0x10d3   :  { %v1416_v33 = vmul.f32 0.25, %v1361_v32  ;;  %v2466_v16 = vpop.f32.mrb[21].mxu1 }
0x10d4   :  { %v1364_v17 = vpop.f32.mrb[22].mxu1  ;;  %v1410_v18 = vpop.f32.mrb[40].mxu0 }
0x10d5   :  { %v1417_v19 = vmul.f32 0.25, %v1410_v18  ;;  %v2467_v21 = vpop.f32.mrb[23].mxu1  ;;  %v2472_v41 = vpop.f32.mrb[41].mxu0  ;;  %v1418_v24 = vadd.f32 %v1416_v33, %v2917_v57 }
0x10d6   :  { %v1413_v25 = vpop.f32.mrb[42].mxu0 }
0x10d7   :  { %v2473_v27 = vpop.f32.mrb[43].mxu0  ;;  %v1420_v29 = vsel %vm582_vm11, %v1418_v24, -inf  ;;  %v1419_v30 = vadd.f32 %v1417_v19, %v2922_v3 }
0x10d8   :  { %1421 = vmax.xlane.f32.xlu1 %v1420_v29 }
0x10d9   :  { %v1423_v31 = vsel %vm582_vm11, %v1419_v30, -inf }
0x10da   :  { %1424 = vmax.xlane.f32.xlu0 %v1423_v31 }
0x10e9   :  { %1492 = vrot.lane.b32.xlu1 %v3090_v11, %s2704_s1 }
0x10f0   :  { %1444 = vrot.lane.b32.xlu0 %v3088_v8, %s2704_s1 }
0x1165   :  { %v1422_v34 = vpop.xlane.xlu1 %1421 }
0x1166   :  { %v1426_v46 = vsub.f32 %v1418_v24, %v1422_v34 }
0x1167   :  { %v1425_v36 = vpop.xlane.xlu0 %1424 }
0x1168   :  { %v1428_v39 = vmul.f32 1.442695, %v1426_v46  ;;  %v1427_v37 = vsub.f32 %v1419_v30, %v1425_v36 }
0x1169   :  { %v1493_v38 = vpop.permute.xlu1 %1492 }
0x116a   :  { %2644 = vpow2.f32 %v1428_v39  ;;  %v1430_v40 = vmul.f32 1.442695, %v1427_v37  ;;  %v1498_v42 = vsel %vm612_vm12, %v1493_v38, 0 }
0x116b   :  { %2481 = vmatpush3.bf16.msra.mxu0 %v1498_v42  ;;  %v1445_v43 = vpop.permute.xlu0 %1444 }
0x116c   :  { %2646 = vpow2.f32 %v1430_v40  ;;  %v1450_v47 = vsel %vm612_vm12, %v1445_v43, 0  ;;  %2492 = vmatprep.subr.bf16.mxu0 %v2700_v22 }
0x116d   :  { %2475 = vmatpush3.bf16.msra.mxu1 %v1450_v47 }
0x116e   :  { %2486 = vmatprep.subr.bf16.mxu1 %v2700_v22 }
0x1174   :  { %v2645_v49 = vpop.eup %2644 }
0x1175   :  { %v1432_v51 = vsel %vm582_vm11, %v2645_v49, 0.0 }
0x1176   :  { %v2647_v52 = vpop.eup %2646  ;;  %1433 = vadd.xlane.f32.xlu0 %v1432_v51 }
0x1177   :  { %v1435_v54 = vsel %vm582_vm11, %v2647_v52, 0.0 }
0x1178   :  { %1436 = vadd.xlane.f32.xlu1 %v1435_v54 }
0x1189   :  { %1542 = vrot.lane.b32.xlu1 %v3088_v8, %s2705_s19 }
0x118c   :  { %1592 = vrot.lane.b32.xlu0 %v3090_v11, %s2705_s19 }
0x118d   :  { %1540 = vrot.lane.b32.xlu1 %v3088_v8, %s2706_s20 }
0x1190   :  { %1590 = vrot.lane.b32.xlu0 %v3090_v11, %s2706_s20 }
0x1203   :  { %v1434_v56 = vpop.xlane.xlu0 %1433 }
0x1204   :  { %2648 = vrcp.f32 %v1434_v56 }
0x1205   :  { %v1437_v58 = vpop.xlane.xlu1 %1436 }
0x1206   :  { %2650 = vrcp.f32 %v1437_v58 }
0x1207   :  { %v1593_v35 = vpop.permute.xlu0 %1592 }
0x1208   :  { %v1598_v6 = vsel %vm157_vm9, %v1593_v35, 0  ;;  %v2601_v35 = vld [vmem:[%s3279_s6 + $0x18] sm:$0xff]  }
0x1209   :  { %v1543_v63 = vpop.permute.xlu1 %1542 }
0x120a   :  { %v1548_v5 = vsel %vm157_vm9, %v1543_v63, 0 }
0x120b   :  { %v1591_v9 = vpop.permute.xlu0 %1590 }
0x120d   :  { %v1541_v7 = vpop.permute.xlu1 %1540 }
0x120e   :  { %v2649_v59 = vpop.eup %2648 }
0x120f   :  { %v1439_v60 = vmul.f32 %v2649_v59, %v2645_v49 }
0x1210   :  { %v2651_v61 = vpop.eup %2650 }
0x1211   :  { %v1441_v0 = vmul.f32 %v2651_v61, %v2647_v52  ;;  %v1442_v4 = vpack.c.bf16 %v1439_v60, %v1439_v60 }
0x1213   :  { %2477 = vmatmul.mubr.msk.bf16.vlgmr.msra.gmra.mrb[24].mxu1 %vm582_vm11, %v1442_v4  ;;  %v1443_v50 = vpack.c.bf16 %v1441_v0, %v1441_v0  ;;  %v2600_v4 = vld [vmem:[%s3279_s6 + $0x10] sm:$0xff]  }
0x1214   :  { %2487 = vmatpush3.bf16.xpose.msra.mxu1 %v1548_v5  ;;  %2488 = vmatprep.mubr.msk.bf16.mxu1 %vm3288_vm0, %v2700_v22 }
0x1215   :  { %2483 = vmatmul.mubr.msk.bf16.vlgmr.msra.gmra.mrb[44].mxu0 %vm582_vm11, %v1443_v50  ;;  %2498 = vmatprep.subr.bf16.mxu1 %v2700_v22 }
0x1216   :  { %2493 = vmatpush3.bf16.xpose.msra.mxu0 %v1598_v6  ;;  %2494 = vmatprep.mubr.msk.bf16.mxu0 %vm3288_vm0, %v2700_v22 }
0x1217   :  { %2504 = vmatprep.subr.bf16.mxu0 %v2700_v22 }
0x121b   :  { %2489 = vmatmul.mubr.msk.bf16.vlgmr.msra.gmra.mrb[28].mxu1 %vm157_vm9, %v1541_v7 }
0x121c   :  { %2500 = vmatprep.mubr.msk.bf16.mxu1 %vm3288_vm0, %v2700_v22 }
0x121d   :  { %2495 = vmatmul.mubr.msk.bf16.vlgmr.msra.gmra.mrb[48].mxu0 %vm157_vm9, %v1591_v9 }
0x121e   :  { %2506 = vmatprep.mubr.msk.bf16.mxu0 %vm3288_vm0, %v2700_v22 }
0x12e6   :  { %v3146_v10 = vpop.f32.mrb[24].mxu1 }
0x12e7   :  { %v2478_v12 = vpop.f32.mrb[25].mxu1 }
0x12e8   :  { %v1489_v14 = vpop.f32.mrb[26].mxu1  ;;  %v3148_v45 = vpop.f32.mrb[44].mxu0 }
0x12e9   :  { %v2479_v15 = vpop.f32.mrb[27].mxu1  ;;  %v2484_v32 = vpop.f32.mrb[45].mxu0 }
0x12ea   :  { %v1537_v33 = vpop.f32.mrb[46].mxu0 }
0x12eb   :  { %v2485_v16 = vpop.f32.mrb[47].mxu0 }
0x12ee   :  { %v1584_v17 = vpop.f32.mrb[28].mxu1 }
0x12ef   :  { %v1640_v18 = vmul.f32 0.25, %v1584_v17  ;;  %v2490_v19 = vpop.f32.mrb[29].mxu1 }
0x12f0   :  { %v1587_v21 = vpop.f32.mrb[30].mxu1  ;;  %v1634_v41 = vpop.f32.mrb[48].mxu0 }
0x12f1   :  { %v1641_v24 = vmul.f32 0.25, %v1634_v41  ;;  %v2491_v25 = vpop.f32.mrb[31].mxu1  ;;  %v2496_v27 = vpop.f32.mrb[49].mxu0  ;;  %v1642_v29 = vadd.f32 %v1640_v18, %v2917_v57  ;;  %v1783_v41 = vrot.slane %v3084_v62, %v2867_v20 }
0x12f2   :  { %v1637_v30 = vpop.f32.mrb[50].mxu0 }
0x12f3   :  { %v2497_v31 = vpop.f32.mrb[51].mxu0  ;;  %v1644_v34 = vsel %vm582_vm11, %v1642_v29, -inf  ;;  %v1643_v46 = vadd.f32 %v1641_v24, %v2922_v3 }
0x12f4   :  { %1645 = vmax.xlane.f32.xlu1 %v1644_v34 }
0x12f5   :  { %v1647_v36 = vsel %vm582_vm11, %v1643_v46, -inf }
0x12f6   :  { %1648 = vmax.xlane.f32.xlu0 %v1647_v36 }
0x1381   :  { %v1646_v39 = vpop.xlane.xlu1 %1645 }
0x1382   :  { %v1650_v37 = vsub.f32 %v1642_v29, %v1646_v39 }
0x1383   :  { %v1649_v38 = vpop.xlane.xlu0 %1648 }
0x1384   :  { %v1652_v40 = vmul.f32 1.442695, %v1650_v37  ;;  %v1651_v42 = vsub.f32 %v1643_v46, %v1649_v38 }
0x1386   :  { %2652 = vpow2.f32 %v1652_v40  ;;  %v1654_v43 = vmul.f32 1.442695, %v1651_v42 }
0x1388   :  { %2654 = vpow2.f32 %v1654_v43 }
0x1390   :  { %v2653_v47 = vpop.eup %2652 }
0x1391   :  { %v1656_v57 = vsel %vm582_vm11, %v2653_v47, 0.0 }
0x1392   :  { %v2655_v49 = vpop.eup %2654  ;;  %1657 = vadd.xlane.f32.xlu0 %v1656_v57  ;;  %v2603_v57 = vld [vmem:[%s3280_s7 + $0x18] sm:$0xff]  }
0x1393   :  { %v1659_v51 = vsel %vm582_vm11, %v2655_v49, 0.0 }
0x1394   :  { %1660 = vadd.xlane.f32.xlu1 %v1659_v51 }
0x13a5   :  { %1716 = vrot.lane.b32.xlu1 %v3090_v11, %s2707_s21 }
0x13a8   :  { %1668 = vrot.lane.b32.xlu0 %v3088_v8, %s2707_s21 }
0x141f   :  { %v1658_v3 = vpop.xlane.xlu0 %1657 }
0x1420   :  { %2656 = vrcp.f32 %v1658_v3 }
0x1421   :  { %v1661_v52 = vpop.xlane.xlu1 %1660 }
0x1422   :  { %2658 = vrcp.f32 %v1661_v52 }
0x1423   :  { %v1669_v54 = vpop.permute.xlu0 %1668 }
0x1424   :  { %v1674_v56 = vsel %vm612_vm12, %v1669_v54, 0 }
0x1425   :  { %v1717_v58 = vpop.permute.xlu1 %1716  ;;  %2499 = vmatpush3.bf16.msra.mxu1 %v1674_v56 }
0x1426   :  { %v1722_v59 = vsel %vm612_vm12, %v1717_v58, 0  ;;  %2510 = vmatprep.subr.bf16.mxu1 %v2700_v22 }
0x1427   :  { %2505 = vmatpush3.bf16.msra.mxu0 %v1722_v59  ;;  %v1871_v59 = vrot.slane %v3084_v62, %v2871_v23  ;;  %v2605_v23 = vld [vmem:[%s3281_s8 + $0x28] sm:$0xff]  }
0x1428   :  { %2518 = vmatprep.subr.bf16.mxu0 %v2700_v22 }
0x142a   :  { %v2657_v11 = vpop.eup %2656 }
0x142b   :  { %v1663_v60 = vmul.f32 %v2657_v11, %v2653_v47 }
0x142c   :  { %v2659_v61 = vpop.eup %2658 }
0x142d   :  { %v1665_v8 = vmul.f32 %v2659_v61, %v2655_v49  ;;  %v1666_v63 = vpack.c.bf16 %v1663_v60, %v1663_v60 }
0x142f   :  { %2501 = vmatmul.mubr.msk.bf16.vlgmr.msra.gmra.mrb[32].mxu1 %vm582_vm11, %v1666_v63  ;;  %v1667_v0 = vpack.c.bf16 %v1665_v8, %v1665_v8  ;;  %v1877_v63 = vrot.slane %v3084_v62, %v1039_v26  ;;  %v2606_v26 = vld [vmem:[%s3281_s8 + $0x30] sm:$0xff]  }
0x1430   :  { %2514 = vmatprep.mubr.msk.bf16.mxu1 %vm3288_vm0, %v2700_v22  ;;  %2511 = vmatpush3.bf16.msra.mxu1 %v2600_v4 }
0x1431   :  { %2507 = vmatmul.mubr.msk.bf16.vlgmr.msra.gmra.mrb[52].mxu0 %vm582_vm11, %v1667_v0  ;;  %2512 = vmatprep.subr.bf16.mxu1 %v2700_v22 }
0x1432   :  { %2522 = vmatprep.mubr.msk.bf16.mxu0 %vm3288_vm0, %v2700_v22 }
0x1434   :  { %2513 = vmatpush3.bf16.msra.mxu1 %v2601_v35 }
0x1435   :  { %2526 = vmatprep.subr.bf16.mxu1 %v2700_v22 }
0x1502   :  { %v1710_v5 = vpop.f32.mrb[32].mxu1 }
0x1503   :  { %v2502_v50 = vpop.f32.mrb[33].mxu1 }
0x1504   :  { %v1713_v6 = vpop.f32.mrb[34].mxu1  ;;  %v1758_v7 = vpop.f32.mrb[52].mxu0  ;;  %v2604_v50 = vld [vmem:[%s3281_s8 + $0x20] sm:$0xff]  }
0x1505   :  { %v2566_v9 = vpack.i.bf16 %v1758_v7, %v1710_v5  ;;  %v2503_v12 = vpop.f32.mrb[35].mxu1  ;;  %v2508_v14 = vpop.f32.mrb[53].mxu0  ;;  %v2607_v6 = vld [vmem:[%s3281_s8 + $0x38] sm:$0xff]   ;;  %v1889_v7 = vrot.slane %v3084_v62, %v1050_v48  ;;  %s2709_s8 = smov 32  }
0x1506   :  { %v1761_v15 = vpop.f32.mrb[54].mxu0 }
0x1507   :  { %2567 = vrot.lane.b32.xlu1 %v2566_v9, %s2708_s25  ;;  %v2509_v32 = vpop.f32.mrb[55].mxu0 }
0x1579   :  { %v2568_v33 = vpop.permute.xlu1 %2567 }
0x157a   :  { %v2570_v16 = vunpack.i.h.bf16 %v2568_v33  ;;  %v2569_v17 = vunpack.i.l.bf16 %v2568_v33 }
0x157c   :  { %v1773_v18 = vsel %vm157_vm9, %v3148_v45, %v2570_v16  ;;  %v1772_v19 = vsel %vm157_vm9, %v3146_v10, %v2569_v17 }
0x157d   :  { %v1774_v21 = vpack.c.bf16 %v1773_v18, %v1772_v19 }
0x157f   :  { %2515 = vmatmul.mubr.msk.bf16.vlgmr.msra.gmra.mrb[36].mxu1 %vm352_vm10, %v1774_v21 }
0x1580   :  { %2534 = vmatprep.mubr.msk.bf16.mxu1 %vm3288_vm0, %v2700_v22  ;;  %2527 = vmatpush3.bf16.msra.mxu1 %v2604_v50  ;;  %v2083_v50 = vrot.slane %v3084_v62, %v1244_v55 }
0x1581   :  { %2528 = vmatprep.subr.bf16.mxu1 %v2700_v22 }
0x1584   :  { %2529 = vmatpush3.bf16.msra.mxu1 %v2605_v23 }
0x1585   :  { %2530 = vmatprep.subr.bf16.mxu1 %v2700_v22 }
0x1588   :  { %2531 = vmatpush3.bf16.msra.mxu1 %v2606_v26 }
0x1589   :  { %2532 = vmatprep.subr.bf16.mxu1 %v2700_v22 }
0x158c   :  { %2533 = vmatpush3.bf16.msra.mxu1 %v2607_v6 }
0x1652   :  { %v1833_v24 = vpop.f32.mrb[36].mxu1 }
0x1653   :  { %v1834_v25 = vadd.f32 %v1833_v24, %v1783_v41  ;;  %v2516_v27 = vpop.f32.mrb[37].mxu1 }
0x1654   :  { %v1836_v29 = vpop.f32.mrb[38].mxu1 }
0x1655   :  { %v1837_v30 = vadd.f32 %v1836_v29, %v1783_v41  ;;  %v2517_v31 = vpop.f32.mrb[39].mxu1  ;;  %v1840_v45 = vadd.f32 %v1834_v25, %v3072_v1 }
0x1657   :  { %v1842_v34 = vsel %vm352_vm10, %v1840_v45, 0.0  ;;  %v1841_v10 = vadd.f32 %v1837_v30, %v3074_v2  ;;  %v2602_v2 = vld [vmem:[%s3280_s7 + $0x10] sm:$0xff]  }
0x1658   :  { %1843 = vadd.xlane.f32.xlu0 %v1842_v34  ;;  %2519 = vmatpush3.bf16.msra.mxu0 %v2602_v2 }
0x1659   :  { %v1845_v46 = vsel %vm352_vm10, %v1841_v10, 0.0  ;;  %2520 = vmatprep.subr.bf16.mxu0 %v2700_v22 }
0x165a   :  { %1846 = vadd.xlane.f32.xlu1 %v1845_v46 }
0x165c   :  { %2521 = vmatpush3.bf16.msra.mxu0 %v2603_v57 }
0x16e5   :  { %v1844_v36 = vpop.xlane.xlu0 %1843 }
0x16e6   :  { %v1848_v39 = vmul.f32 0.03125, %v1844_v36 }
0x16e7   :  { %v1847_v37 = vpop.xlane.xlu1 %1846 }
0x16e8   :  { %v1850_v20 = vsub.f32 %v1840_v45, %v1848_v39  ;;  %v1849_v38 = vmul.f32 0.03125, %v1847_v37  ;;  %v1977_v39 = vrot.slane %v3084_v62, %v1137_v13 }
0x16ea   :  { %v1851_v40 = vsub.f32 %v1841_v10, %v1849_v38  ;;  %v1852_v42 = vmul.f32 %v1850_v20, %v1850_v20 }
0x16ec   :  { %v1854_v43 = vsel %vm352_vm10, %v1852_v42, 0.0  ;;  %v1853_v47 = vmul.f32 %v1851_v40, %v1851_v40 }
0x16ed   :  { %1855 = vadd.xlane.f32.xlu0 %v1854_v43 }
0x16ee   :  { %v1857_v1 = vsel %vm352_vm10, %v1853_v47, 0.0 }
0x16f1   :  { %1858 = vadd.xlane.f32.xlu0 %v1857_v1 }
0x177a   :  { %v1856_v49 = vpop.xlane.xlu0 %1855 }
0x177b   :  { %v1860_v51 = vmul.f32 0.03125, %v1856_v49 }
0x177d   :  { %v1862_v3 = vadd.f32 1e-12, %v1860_v51 }
0x177e   :  { %v1859_v52 = vpop.xlane.xlu0 %1858 }
0x177f   :  { %2660 = vrsqrt.f32 %v1862_v3  ;;  %v1861_v54 = vmul.f32 0.03125, %v1859_v52 }
0x1781   :  { %v1863_v56 = vadd.f32 1e-12, %v1861_v54 }
0x1783   :  { %2662 = vrsqrt.f32 %v1863_v56 }
0x1789   :  { %v2661_v58 = vpop.eup %2660 }
0x178a   :  { %v1866_v11 = vmul.f32 %v2661_v58, %v1850_v20 }
0x178c   :  { %v1872_v61 = vmul.f32 %v1871_v59, %v1866_v11 }
0x178d   :  { %v2663_v60 = vpop.eup %2662 }
0x178e   :  { %v1867_v8 = vmul.f32 %v2663_v60, %v1851_v40  ;;  %v1878_v4 = vadd.f32 %v1877_v63, %v1872_v61 }
0x1790   :  { %v1873_v0 = vmul.f32 %v1871_v59, %v1867_v8 }
0x1792   :  { %v1879_v35 = vadd.f32 %v1877_v63, %v1873_v0 }
0x1794   :  { %v1880_v5 = vpack.c.bf16 %v1879_v35, %v1878_v4 }
0x1796   :  { %2523 = vmatmul.mubr.msk.bf16.vlgmr.msra.gmra.mrb[56].mxu0 %vm352_vm10, %v1880_v5 }
0x1869   :  { %v1939_v9 = vpop.f32.mrb[56].mxu0 }
0x186a   :  { %v1940_v12 = vadd.f32 %v1939_v9, %v1889_v7  ;;  %v2524_v14 = vpop.f32.mrb[57].mxu0 }
0x186b   :  { %v1942_v15 = vpop.f32.mrb[58].mxu0 }
0x186c   :  { %v1948_v32 = vmul.f32 0.044715, %v1940_v12  ;;  %v1943_v33 = vadd.f32 %v1942_v15, %v1889_v7  ;;  %v2525_v16 = vpop.f32.mrb[59].mxu0  ;;  %v1946_v31 = vmul.f32 0.5, %v1940_v12 }
0x186e   :  { %v1950_v17 = vmul.f32 %v1948_v32, %v1940_v12  ;;  %v1949_v18 = vmul.f32 0.044715, %v1943_v33  ;;  %v1947_v45 = vmul.f32 0.5, %v1943_v33 }
0x1870   :  { %v1952_v19 = vmul.f32 %v1950_v17, %v1940_v12  ;;  %v1951_v21 = vmul.f32 %v1949_v18, %v1943_v33 }
0x1872   :  { %v1954_v41 = vadd.f32 %v1952_v19, %v1940_v12  ;;  %v1953_v24 = vmul.f32 %v1951_v21, %v1943_v33 }
0x1874   :  { %v1956_v25 = vmul.f32 0.7978846, %v1954_v41  ;;  %v1955_v22 = vadd.f32 %v1953_v24, %v1943_v33 }
0x1876   :  { %2664 = vtanh.f32 %v1956_v25  ;;  %v1957_v27 = vmul.f32 0.7978846, %v1955_v22 }
0x1878   :  { %2666 = vtanh.f32 %v1957_v27 }
0x1880   :  { %v2665_v29 = vpop.eup %2664 }
0x1881   :  { %v1960_v48 = vadd.f32 1.0, %v2665_v29 }
0x1882   :  { %v2667_v30 = vpop.eup %2666 }
0x1883   :  { %v1961_v34 = vadd.f32 1.0, %v2667_v30  ;;  %v1962_v10 = vmul.f32 %v1960_v48, %v1946_v31 }
0x1885   :  { %v1963_v46 = vmul.f32 %v1961_v34, %v1947_v45 }
0x1887   :  { %v1964_v36 = vpack.c.bf16 %v1963_v46, %v1962_v10 }
0x1889   :  { %2535 = vmatmul.mubr.msk.bf16.vlgmr.msra.gmra.mrb[40].mxu1 %vm1163_vm13, %v1964_v36 }
0x195c   :  { %v2039_v37 = vpop.f32.mrb[40].mxu1 }
0x195d   :  { %v2040_v20 = vadd.f32 %v2039_v37, %v1977_v39  ;;  %v2536_v38 = vpop.f32.mrb[41].mxu1 }
0x195e   :  { %v2042_v40 = vpop.f32.mrb[42].mxu1 }
0x195f   :  { %v2043_v42 = vadd.f32 %v2042_v40, %v1977_v39  ;;  %v2537_v43 = vpop.f32.mrb[43].mxu1  ;;  %v2046_v47 = vadd.f32 %v2040_v20, %v1878_v4  ;;  %v2710_v39 = vmov 1966171168  }
0x1960   :  { %v2142_v37 = vunpack.c.l.s4 %v2710_v39 }
0x1961   :  { %v2048_v1 = vsel %vm352_vm10, %v2046_v47, 0.0  ;;  %v2047_v2 = vadd.f32 %v2043_v42, %v1879_v35  ;;  %v2077_v35 = vrot.slane %v3084_v62, %v1238_v53 }
0x1962   :  { %2049 = vadd.xlane.f32.xlu1 %v2048_v1  ;;  %v2143_v38 = vunpack.c.0.s8 %v2142_v37 }
0x1963   :  { %v2051_v57 = vsel %vm352_vm10, %v2047_v2, 0.0 }
0x1964   :  { %2052 = vadd.xlane.f32.xlu0 %v2051_v57 }
0x19ef   :  { %v2050_v49 = vpop.xlane.xlu1 %2049 }
0x19f0   :  { %v2054_v51 = vmul.f32 0.03125, %v2050_v49 }
0x19f1   :  { %v2053_v3 = vpop.xlane.xlu0 %2052 }
0x19f2   :  { %v2056_v52 = vsub.f32 %v2046_v47, %v2054_v51  ;;  %v2055_v54 = vmul.f32 0.03125, %v2053_v3 }
0x19f4   :  { %v2057_v13 = vsub.f32 %v2047_v2, %v2055_v54  ;;  %v2058_v56 = vmul.f32 %v2056_v52, %v2056_v52  ;;  %v2146_v2 = vsub.s32 %v2143_v38, %v2845_v44 }
0x19f6   :  { %v2060_v58 = vsel %vm352_vm10, %v2058_v56, 0.0  ;;  %v2059_v59 = vmul.f32 %v2057_v13, %v2057_v13 }
0x19f7   :  { %2061 = vadd.xlane.f32.xlu1 %v2060_v58 }
0x19f8   :  { %v2063_v11 = vsel %vm352_vm10, %v2059_v59, 0.0 }
0x19f9   :  { %2064 = vadd.xlane.f32.xlu0 %v2063_v11 }
0x1a84   :  { %v2062_v60 = vpop.xlane.xlu1 %2061 }
0x1a85   :  { %v2066_v61 = vmul.f32 0.03125, %v2062_v60 }
0x1a86   :  { %v2065_v8 = vpop.xlane.xlu0 %2064 }
0x1a87   :  { %v2068_v63 = vadd.f32 1e-12, %v2066_v61  ;;  %v2067_v0 = vmul.f32 0.03125, %v2065_v8 }
0x1a89   :  { %2668 = vrsqrt.f32 %v2068_v63  ;;  %v2069_v4 = vadd.f32 1e-12, %v2067_v0 }
0x1a8b   :  { %2670 = vrsqrt.f32 %v2069_v4 }
0x1a93   :  { %v2669_v5 = vpop.eup %2668 }
0x1a94   :  { %v2072_v23 = vmul.f32 %v2669_v5, %v2056_v52 }
0x1a95   :  { %v2671_v26 = vpop.eup %2670 }
0x1a96   :  { %v2078_v6 = vmul.f32 %v2077_v35, %v2072_v23  ;;  %v2073_v7 = vmul.f32 %v2671_v26, %v2057_v13 }
0x1a98   :  { %v2084_v9 = vadd.f32 %v2083_v50, %v2078_v6  ;;  %v2079_v12 = vmul.f32 %v2077_v35, %v2073_v7 }
0x1a9a   :  { %v2085_v14 = vadd.f32 %v2083_v50, %v2079_v12  ;;  %v2092_v15 = vrot.slane %v2084_v9, 1  ;;  %v2113_v33 = vrot.slane %v2084_v9, 5  ;;  %v2109_v18 = vrot.slane %v2084_v9, 4 }
0x1a9b   :  { %v2097_v19 = vrot.slane %v2084_v9, 2  ;;  %v2103_v22 = vrot.slane %v2084_v9, 3  ;;  %v2119_v48 = vrot.slane %v2084_v9, 6  ;;  %v2125_v45 = vrot.slane %v2084_v9, 7 }
0x1a9c   :  { %v2093_v32 = vsel %vm2089_vm14, %v2085_v14, %v2092_v15  ;;  %v2114_v16 = vrot.slane %v2085_v14, 4  ;;  %v2098_v17 = vrot.slane %v2085_v14, 1  ;;  %v2088_v53 = vrot.slane %v2085_v14, 7 }
0x1a9d   :  { %2094 = vrot.lane.b32.xlu1 %v2093_v32, %s2709_s8  ;;  %v2110_v55 = vrot.slane %v2085_v14, 3  ;;  %v2104_v21 = vrot.slane %v2085_v14, 2  ;;  %v2120_v27 = vrot.slane %v2085_v14, 5  ;;  %v2126_v31 = vrot.slane %v2085_v14, 6 }
0x1a9e   :  { %v2115_v62 = vsel %vm2089_vm14, %v2114_v16, %v2113_v33  ;;  %v2090_v41 = vsel %vm2089_vm14, %v2088_v53, %v2084_v9  ;;  %v2099_v25 = vsel %vm2089_vm14, %v2098_v17, %v2097_v19 }
0x1a9f   :  { %2116 = vrot.lane.b32.xlu0 %v2115_v62, %s2709_s8  ;;  %v2111_v24 = vsel %vm2089_vm14, %v2110_v55, %v2109_v18  ;;  %v2105_v29 = vsel %vm2089_vm14, %v2104_v21, %v2103_v22  ;;  %v2121_v30 = vsel %vm2089_vm14, %v2120_v27, %v2119_v48  ;;  %v2127_v34 = vsel %vm2089_vm14, %v2126_v31, %v2125_v45 }
0x1aa1   :  { %2100 = vrot.lane.b32.xlu1 %v2099_v25, %s2704_s1 }
0x1aa3   :  { %2106 = vrot.lane.b32.xlu0 %v2105_v29, %s2703_s14 }
0x1aa5   :  { %2122 = vrot.lane.b32.xlu1 %v2121_v30, %s2704_s1 }
0x1aa9   :  { %2128 = vrot.lane.b32.xlu1 %v2127_v34, %s2703_s14  ;;  %s2711_s14 = smov [#allocation2]  }
0x1aaa   :  { %s2176_s1 = sshll.u32 %s2711_s14, 4  ;;  %s2177_s1 = int_to_ptr.vmem [resolvable:$true] %s2176_s1 }
0x1aab   :  { %s2672_s30 = scalar_lea.vmem %s2177_s1, 64  ;;  %p2677_p1 = scmp.lt.s32.totalorder %s2177_s1, %s2177_s1 }
0x1aac   :  { %p2673_p0 = scmp.ne.s32.totalorder %s2177_s1, %s2672_s30  ;;  %p2678_p2 = scmp.lt.s32.totalorder %s2672_s30, %s2672_s30 }
0x1aae   :  { %p2679_p3 = por %p2678_p2, %p2677_p1 }
0x1ab0   :  { %p2680_p4 = pnand %p2679_p3, %p2673_p0 }
0x1b0f   :  { %v2095_v10 = vpop.permute.xlu1 %2094 }
0x1b10   :  { %v2131_v40 = vsel %vm352_vm10, %v2090_v41, %v2095_v10 }
0x1b11   :  { %v2117_v46 = vpop.permute.xlu0 %2116 }
0x1b12   :  { %v2135_v47 = vsel %vm352_vm10, %v2111_v24, %v2117_v46 }
0x1b13   :  { %v2101_v36 = vpop.permute.xlu1 %2100 }
0x1b14   :  { %v2132_v42 = vsel %vm1163_vm13, %v2131_v40, %v2101_v36 }
0x1b15   :  { %v2107_v43 = vpop.permute.xlu0 %2106 }
0x1b16   :  { %v2134_v49 = vsel %vm2133_vm15, %v2132_v42, %v2107_v43 }
0x1b17   :  { %v2123_v20 = vpop.permute.xlu1 %2122 }
0x1b18   :  { %v2136_v1 = vsel %vm1163_vm13, %v2135_v47, %v2123_v20 }
0x1b1b   :  { %v2129_v57 = vpop.permute.xlu1 %2128 }
0x1b1c   :  { %v2137_v51 = vsel %vm2133_vm15, %v2136_v1, %v2129_v57 }
0x1b1d   :  { %v2140_v3 = vcombine.low %v2134_v49, %v2137_v51 }
0x1b1f   :  { %v2147_v52 = vrot.slane %v2140_v3, %v2146_v2 }
0x1b21   :  { %v2148_v54 = vcombine.high %v2147_v52, %v2147_v52  ;;  %v2155_v13 = vrot.slane %v2147_v52, %v2146_v2 }
0x1b23   :  { %v2162_v56 = vrot.slane %v2148_v54, %v2146_v2  ;;  %2169 = vst.msk [vmem:[#allocation2] sm:$0x3] %vm2167_vm1, %v2155_v13 }
0x1b25   :  { %2170 = vst.msk [vmem:[#allocation2 + $0x2] sm:$0x3] %vm2167_vm1, %v2162_v56 }
0x1b26   :  { %2683 = shalt.err (!%p2680_p4)
}
0x1b27   :  { %s2684_s13 = scalar_lea.hbm %s3283_s10, 64 }
0x1b28   :  { %p2685_p5 = scmp.ne.s32.totalorder %s3283_s10, %s2684_s13  ;;  %p2688_p6 = scmp.lt.u32.totalorder %s2684_s13, %s3283_s10 }
0x1b2a   :  { %p2690_p7 = pnand %p2688_p6, %p2685_p5 }
0x1b2c   :  { %2693 = shalt.err (!%p2690_p7)
}
0x1b2d   :  { %s2712_s22 = smov 2  }
0x1b2e   :  { %2182 = dma.vmem_to_hbm [thread:$0]  %s2177_s1, 64, %s3283_s10, [#allocation3], %s2709_s8, %s2709_s8, %s2712_s22  }
0x1b2f   :  { %2694 = dma.done.wait [#allocation3], 64  }
0x1b30   :  { %2695 = vsyncadd [#allocation3], 4294967232 }
0x1b31   :  { %2186 = vsyncpa [#allocation3], 1 }

</bundles_post_ra>
